<compile_context>
chip_gen: v6e
topology: v6e:2x2x1
jax: 0.10.0
libtpu: 0.0.40
codegen_flags: <defaults>
</compile_context>

<pallas_src>
import jax
import jax.numpy as jnp
from jax.experimental import pallas as pl
from jax.experimental.pallas import tpu as pltpu

# Small, self-consistent hyper-params (scaled down from n_embd=384 / n_heads=6)
B = 2                      # batch
T = 16                     # sequence length (block_size)
C = 128                    # n_embd
N_HEADS = 4
HEAD_SIZE = C // N_HEADS   # 32
HIDDEN = 4 * C             # FFN hidden
LN_EPS = 1e-5
NEG_INF = -1e30            # finite additive mask (safer than -inf)


def _block_kernel(x_ref,
                  ln1g_ref, ln1b_ref,
                  wq_ref, wk_ref, wv_ref,      # (H, C, D) bf16 each
                  wp_ref, bp_ref,              # (H, D, C) bf16, (1, C) f32
                  ln2g_ref, ln2b_ref,
                  w1_ref, b1_ref, w2_ref, b2_ref,
                  out_ref):
    H, D = N_HEADS, HEAD_SIZE
    BT, BH = B * T, B * N_HEADS
    bf16, f32 = jnp.bfloat16, jnp.float32

    x = x_ref[...].astype(f32).reshape(BT, C)          # whole batch in one slab

    def layernorm(v, g, b):
        mu = jnp.mean(v, axis=-1, keepdims=True)
        var = jnp.mean((v - mu) ** 2, axis=-1, keepdims=True)
        return (v - mu) * jax.lax.rsqrt(var + LN_EPS) * g + b

    def bcast_heads(w):
        # (H, a, b) -> (B*H, a, b): replicate per batch element so attention is
        # a single batched contraction (no lane slicing / transposes / concat).
        return jnp.broadcast_to(w[None], (B,) + w.shape).reshape((BH,) + w.shape[1:])

    # ---------------- multi-head causal self-attention ----------------
    xn = layernorm(x, ln1g_ref[...], ln1b_ref[...])                      # (BT, C) f32

    # Q/K/V produced directly in head-major (B*H, T, D) layout.
    xn_b = jnp.broadcast_to(xn.astype(bf16).reshape(B, 1, T, C),
                            (B, H, T, C)).reshape(BH, T, C)              # (BH, T, C) bf16
    q3 = jnp.einsum('ntc,ncd->ntd', xn_b, bcast_heads(wq_ref[...]),
                    preferred_element_type=f32)                          # (BH, T, D)
    k3 = jnp.einsum('ntc,ncd->ntd', xn_b, bcast_heads(wk_ref[...]),
                    preferred_element_type=f32)
    v3 = jnp.einsum('ntc,ncd->ntd', xn_b, bcast_heads(wv_ref[...]),
                    preferred_element_type=f32)

    # Additive causal mask (0 on/below diagonal, -1e30 above), built once.
    row = jax.lax.broadcasted_iota(jnp.int32, (T, T), 0)
    col = jax.lax.broadcasted_iota(jnp.int32, (T, T), 1)
    mask_add = jnp.where(col <= row, 0.0, NEG_INF).astype(f32)           # (T, T)

    scale = 1.0 / (HEAD_SIZE ** 0.5)
    s = jnp.einsum('ntd,nsd->nts', q3.astype(bf16), k3.astype(bf16),
                   preferred_element_type=f32) * scale + mask_add        # (BH, T, T)
    s = s - jnp.max(s, axis=-1, keepdims=True)
    p = jnp.exp(s)
    p = p * pl.reciprocal(jnp.sum(p, axis=-1, keepdims=True), approx=True)

    ctx = jnp.einsum('nts,nsd->ntd', p.astype(bf16), v3.astype(bf16),
                     preferred_element_type=f32)                         # (BH, T, D)

    # Output projection: contract each head against its (D, C) weight slice and
    # sum over heads -- no lane-dim concatenation.
    attn_parts = jnp.einsum('ntd,ndc->ntc', ctx.astype(bf16),
                            bcast_heads(wp_ref[...]),
                            preferred_element_type=f32)                  # (BH, T, C)
    attn = attn_parts.reshape(B, H, T, C).sum(axis=1).reshape(BT, C) + bp_ref[...]
    x1 = x + attn                                                        # residual 1

    # ---------------- feed-forward network ----------------
    xn2 = layernorm(x1, ln2g_ref[...], ln2b_ref[...])
    h1 = jnp.dot(xn2.astype(bf16), w1_ref[...],
                 preferred_element_type=f32) + b1_ref[...]
    h1 = jnp.maximum(h1, 0.0)                                            # ReLU
    ffn = jnp.dot(h1.astype(bf16), w2_ref[...],
                  preferred_element_type=f32) + b2_ref[...]

    out_ref[...] = (x1 + ffn).reshape(B, T, C).astype(out_ref.dtype)     # residual 2


def transformer_block(x, params):
    """x: (B, T, C) float32. params: dict of f32 weights (nn-style layout)."""
    H, D = N_HEADS, HEAD_SIZE
    bf16 = jnp.bfloat16
    # Host-side restructuring (done once, outside the kernel):
    #   QKV weights  -> head-major (H, C, D) bf16
    #   proj weight  -> head-major (H, D, C) bf16
    #   FFN weights  -> bf16; LN params and biases stay f32.
    wq_h = params["wq"].reshape(C, H, D).transpose(1, 0, 2).astype(bf16)
    wk_h = params["wk"].reshape(C, H, D).transpose(1, 0, 2).astype(bf16)
    wv_h = params["wv"].reshape(C, H, D).transpose(1, 0, 2).astype(bf16)
    wp_h = params["wp"].reshape(H, D, C).astype(bf16)

    args = [
        params["ln1_g"], params["ln1_b"],
        wq_h, wk_h, wv_h,
        wp_h, params["bp"],
        params["ln2_g"], params["ln2_b"],
        params["w1"].astype(bf16), params["b1"],
        params["w2"].astype(bf16), params["b2"],
    ]

    # Single invocation (no grid): every operand lives whole in VMEM, so weights
    # are single-buffered and there is no per-step pipeline overhead.
    # (At larger B one could reintroduce a "parallel" batch grid for v7x's 2 TCs.)
    vmem = lambda: pl.BlockSpec(memory_space=pltpu.MemorySpace.VMEM)
    return pl.pallas_call(
        _block_kernel,
        out_shape=jax.ShapeDtypeStruct(x.shape, x.dtype),
        in_specs=[vmem() for _ in range(1 + len(args))],
        out_specs=vmem(),
    )(x, *args)


def make_params(key):
    """Deterministic synthetic parameters (kernel layout: y = x @ W + b), f32."""
    ks = jax.random.split(key, 10)
    scale = 0.02
    return {
        "ln1_g": jnp.ones((1, C), jnp.float32),
        "ln1_b": jnp.zeros((1, C), jnp.float32),
        "ln2_g": jnp.ones((1, C), jnp.float32),
        "ln2_b": jnp.zeros((1, C), jnp.float32),
        # Q/K/V: columns grouped per head (head h -> cols h*hs:(h+1)*hs)
        "wq": scale * jax.random.normal(ks[0], (C, C), jnp.float32),
        "wk": scale * jax.random.normal(ks[1], (C, C), jnp.float32),
        "wv": scale * jax.random.normal(ks[2], (C, C), jnp.float32),
        # output projection (already transposed: out @ wp + bp)
        "wp": scale * jax.random.normal(ks[3], (C, C), jnp.float32),
        "bp": scale * jax.random.normal(ks[4], (1, C), jnp.float32),
        # FFN (already transposed)
        "w1": scale * jax.random.normal(ks[5], (C, HIDDEN), jnp.float32),
        "b1": scale * jax.random.normal(ks[6], (1, HIDDEN), jnp.float32),
        "w2": scale * jax.random.normal(ks[7], (HIDDEN, C), jnp.float32),
        "b2": scale * jax.random.normal(ks[8], (1, C), jnp.float32),
    }


def reference_block(x, p):
    """Pure-JAX f32 reference mirroring the PyTorch forward (eval mode)."""
    def ln(v, g, b):
        mu = v.mean(-1, keepdims=True)
        var = ((v - mu) ** 2).mean(-1, keepdims=True)
        return (v - mu) / jnp.sqrt(var + LN_EPS) * g + b

    xn = ln(x, p["ln1_g"], p["ln1_b"])
    q = xn @ p["wq"]
    k = xn @ p["wk"]
    v = xn @ p["wv"]
    qh = q.reshape(B, T, N_HEADS, HEAD_SIZE).transpose(0, 2, 1, 3)
    kh = k.reshape(B, T, N_HEADS, HEAD_SIZE).transpose(0, 2, 1, 3)
    vh = v.reshape(B, T, N_HEADS, HEAD_SIZE).transpose(0, 2, 1, 3)
    wei = jnp.einsum("bhqd,bhkd->bhqk", qh, kh) * HEAD_SIZE ** -0.5
    mask = jnp.tril(jnp.ones((T, T), bool))
    wei = jnp.where(mask, wei, -jnp.inf)
    wei = jax.nn.softmax(wei, axis=-1)
    attn = jnp.einsum("bhqk,bhkd->bhqd", wei, vh)
    attn = attn.transpose(0, 2, 1, 3).reshape(B, T, C)
    x1 = x + attn @ p["wp"] + p["bp"]
    xn2 = ln(x1, p["ln2_g"], p["ln2_b"])
    ffn = jnp.maximum(xn2 @ p["w1"] + p["b1"], 0.0) @ p["w2"] + p["b2"]
    return x1 + ffn


if __name__ == "__main__":
    key = jax.random.PRNGKey(0)
    kx, kp = jax.random.split(key)
    x = jax.random.normal(kx, (B, T, C), jnp.float32)
    params = make_params(kp)

    out = transformer_block(x, params)
    out = jax.block_until_ready(out)

    ref = reference_block(x, params)
    assert out.shape == (B, T, C)
    # Tolerance deliberately loosened vs. the f32 reference: kernel uses bf16
    # matmul operands (f32 accumulation) and an approximate reciprocal in softmax.
    assert jnp.allclose(out, ref, atol=2e-2, rtol=2e-2), "mismatch vs reference"

    print("KERNEL_OK")
</pallas_src>

<mosaic_0001>
module attributes {stable_mosaic.version = 11 : i64} {
  func.func @_block_kernel(%arg0: memref<2x16x128xf32, #tpu.memory_space<vmem>>, %arg1: memref<1x128xf32, #tpu.memory_space<vmem>>, %arg2: memref<1x128xf32, #tpu.memory_space<vmem>>, %arg3: memref<4x128x32xbf16, #tpu.memory_space<vmem>>, %arg4: memref<4x128x32xbf16, #tpu.memory_space<vmem>>, %arg5: memref<4x128x32xbf16, #tpu.memory_space<vmem>>, %arg6: memref<4x32x128xbf16, #tpu.memory_space<vmem>>, %arg7: memref<1x128xf32, #tpu.memory_space<vmem>>, %arg8: memref<1x128xf32, #tpu.memory_space<vmem>>, %arg9: memref<1x128xf32, #tpu.memory_space<vmem>>, %arg10: memref<128x512xbf16, #tpu.memory_space<vmem>>, %arg11: memref<1x512xf32, #tpu.memory_space<vmem>>, %arg12: memref<512x128xbf16, #tpu.memory_space<vmem>>, %arg13: memref<1x128xf32, #tpu.memory_space<vmem>>, %arg14: memref<2x16x128xf32, #tpu.memory_space<vmem>>) attributes {dimension_semantics = [], scalar_prefetch = 0 : i64, scratch_operands = 0 : i64, tpu.core_type = #tpu.core_type<tc>} {
    %c0 = arith.constant 0 : index
    %c0_0 = arith.constant 0 : index
    %c0_1 = arith.constant 0 : index
    %0 = vector.load %arg0[%c0, %c0_0, %c0_1] : memref<2x16x128xf32, #tpu.memory_space<vmem>>, vector<2x16x128xf32>
    %1 = vector.shape_cast %0 : vector<2x16x128xf32> to vector<32x128xf32>
    %c0_2 = arith.constant 0 : index
    %c0_3 = arith.constant 0 : index
    %2 = vector.load %arg1[%c0_2, %c0_3] : memref<1x128xf32, #tpu.memory_space<vmem>>, vector<1x128xf32>
    %c0_4 = arith.constant 0 : index
    %c0_5 = arith.constant 0 : index
    %3 = vector.load %arg2[%c0_4, %c0_5] : memref<1x128xf32, #tpu.memory_space<vmem>>, vector<1x128xf32>
    %cst = arith.constant dense<0.000000e+00> : vector<32xf32>
    %4 = vector.multi_reduction <add>, %1, %cst [1] : vector<32x128xf32> to vector<32xf32>
    %5 = vector.shape_cast %4 : vector<32xf32> to vector<32x1xf32>
    %cst_6 = arith.constant 1.280000e+02 : f32
    %6 = vector.broadcast %cst_6 : f32 to vector<32x1xf32>
    %7 = arith.divf %5, %6 : vector<32x1xf32>
    %8 = vector.broadcast %7 : vector<32x1xf32> to vector<32x128xf32>
    %9 = arith.subf %1, %8 : vector<32x128xf32>
    %10 = arith.mulf %9, %9 : vector<32x128xf32>
    %cst_7 = arith.constant dense<0.000000e+00> : vector<32xf32>
    %11 = vector.multi_reduction <add>, %10, %cst_7 [1] : vector<32x128xf32> to vector<32xf32>
    %12 = vector.shape_cast %11 : vector<32xf32> to vector<32x1xf32>
    %cst_8 = arith.constant 1.280000e+02 : f32
    %13 = vector.broadcast %cst_8 : f32 to vector<32x1xf32>
    %14 = arith.divf %12, %13 : vector<32x1xf32>
    %15 = vector.broadcast %7 : vector<32x1xf32> to vector<32x128xf32>
    %16 = arith.subf %1, %15 : vector<32x128xf32>
    %cst_9 = arith.constant 9.99999974E-6 : f32
    %17 = vector.broadcast %cst_9 : f32 to vector<32x1xf32>
    %18 = arith.addf %14, %17 : vector<32x1xf32>
    %19 = math.rsqrt %18 : vector<32x1xf32>
    %20 = vector.broadcast %19 : vector<32x1xf32> to vector<32x128xf32>
    %21 = arith.mulf %16, %20 : vector<32x128xf32>
    %22 = vector.broadcast %2 : vector<1x128xf32> to vector<32x128xf32>
    %23 = arith.mulf %21, %22 : vector<32x128xf32>
    %24 = vector.broadcast %3 : vector<1x128xf32> to vector<32x128xf32>
    %25 = arith.addf %23, %24 : vector<32x128xf32>
    %26 = arith.truncf %25 : vector<32x128xf32> to vector<32x128xbf16>
    %27 = vector.shape_cast %26 : vector<32x128xbf16> to vector<2x1x16x128xbf16>
    %28 = vector.shape_cast %27 : vector<2x1x16x128xbf16> to vector<2x1x16x128xbf16>
    %29 = vector.broadcast %28 : vector<2x1x16x128xbf16> to vector<2x4x16x128xbf16>
    %30 = vector.shape_cast %29 : vector<2x4x16x128xbf16> to vector<8x16x128xbf16>
    %c0_10 = arith.constant 0 : index
    %c0_11 = arith.constant 0 : index
    %c0_12 = arith.constant 0 : index
    %31 = vector.load %arg3[%c0_10, %c0_11, %c0_12] : memref<4x128x32xbf16, #tpu.memory_space<vmem>>, vector<4x128x32xbf16>
    %32 = vector.shape_cast %31 : vector<4x128x32xbf16> to vector<1x4x128x32xbf16>
    %33 = vector.shape_cast %32 : vector<1x4x128x32xbf16> to vector<1x4x128x32xbf16>
    %34 = vector.broadcast %33 : vector<1x4x128x32xbf16> to vector<2x4x128x32xbf16>
    %35 = vector.shape_cast %34 : vector<2x4x128x32xbf16> to vector<8x128x32xbf16>
    "tpu.trace_start"() <{level = 10 : i32, message = "ntc,ncd->ntd"}> : () -> ()
    %cst_13 = arith.constant dense<0.000000e+00> : vector<8x16x32xf32>
    %36 = tpu.matmul %30, %35, %cst_13 {dimension_numbers = #tpu.dot_dimension_numbers<[2], [1], [1], [2], [0, 0, 0, 1, 1, 2], [0], [0]>} : vector<8x16x128xbf16>, vector<8x128x32xbf16>, vector<8x16x32xf32> -> vector<8x16x32xf32>
    "tpu.trace_stop"() : () -> ()
    %c0_14 = arith.constant 0 : index
    %c0_15 = arith.constant 0 : index
    %c0_16 = arith.constant 0 : index
    %37 = vector.load %arg4[%c0_14, %c0_15, %c0_16] : memref<4x128x32xbf16, #tpu.memory_space<vmem>>, vector<4x128x32xbf16>
    %38 = vector.shape_cast %37 : vector<4x128x32xbf16> to vector<1x4x128x32xbf16>
    %39 = vector.shape_cast %38 : vector<1x4x128x32xbf16> to vector<1x4x128x32xbf16>
    %40 = vector.broadcast %39 : vector<1x4x128x32xbf16> to vector<2x4x128x32xbf16>
    %41 = vector.shape_cast %40 : vector<2x4x128x32xbf16> to vector<8x128x32xbf16>
    "tpu.trace_start"() <{level = 10 : i32, message = "ntc,ncd->ntd"}> : () -> ()
    %cst_17 = arith.constant dense<0.000000e+00> : vector<8x16x32xf32>
    %42 = tpu.matmul %30, %41, %cst_17 {dimension_numbers = #tpu.dot_dimension_numbers<[2], [1], [1], [2], [0, 0, 0, 1, 1, 2], [0], [0]>} : vector<8x16x128xbf16>, vector<8x128x32xbf16>, vector<8x16x32xf32> -> vector<8x16x32xf32>
    "tpu.trace_stop"() : () -> ()
    %c0_18 = arith.constant 0 : index
    %c0_19 = arith.constant 0 : index
    %c0_20 = arith.constant 0 : index
    %43 = vector.load %arg5[%c0_18, %c0_19, %c0_20] : memref<4x128x32xbf16, #tpu.memory_space<vmem>>, vector<4x128x32xbf16>
    %44 = vector.shape_cast %43 : vector<4x128x32xbf16> to vector<1x4x128x32xbf16>
    %45 = vector.shape_cast %44 : vector<1x4x128x32xbf16> to vector<1x4x128x32xbf16>
    %46 = vector.broadcast %45 : vector<1x4x128x32xbf16> to vector<2x4x128x32xbf16>
    %47 = vector.shape_cast %46 : vector<2x4x128x32xbf16> to vector<8x128x32xbf16>
    "tpu.trace_start"() <{level = 10 : i32, message = "ntc,ncd->ntd"}> : () -> ()
    %cst_21 = arith.constant dense<0.000000e+00> : vector<8x16x32xf32>
    %48 = tpu.matmul %30, %47, %cst_21 {dimension_numbers = #tpu.dot_dimension_numbers<[2], [1], [1], [2], [0, 0, 0, 1, 1, 2], [0], [0]>} : vector<8x16x128xbf16>, vector<8x128x32xbf16>, vector<8x16x32xf32> -> vector<8x16x32xf32>
    "tpu.trace_stop"() : () -> ()
    %49 = tpu.iota {dimensions = array<i32: 0>} : vector<16x16xi32>
    %50 = tpu.iota {dimensions = array<i32: 1>} : vector<16x16xi32>
    %51 = arith.cmpi sle, %50, %49 : vector<16x16xi32>
    %cst_22 = arith.constant 0.000000e+00 : f32
    %cst_23 = arith.constant -1.000000e+30 : f32
    %52 = vector.broadcast %cst_22 : f32 to vector<16x16xf32>
    %53 = vector.broadcast %cst_23 : f32 to vector<16x16xf32>
    %54 = arith.select %51, %52, %53 : vector<16x16xi1>, vector<16x16xf32>
    %55 = arith.truncf %36 : vector<8x16x32xf32> to vector<8x16x32xbf16>
    %56 = arith.truncf %42 : vector<8x16x32xf32> to vector<8x16x32xbf16>
    "tpu.trace_start"() <{level = 10 : i32, message = "ntd,nsd->nts"}> : () -> ()
    %cst_24 = arith.constant dense<0.000000e+00> : vector<8x16x16xf32>
    %57 = tpu.matmul %55, %56, %cst_24 {dimension_numbers = #tpu.dot_dimension_numbers<[2], [2], [1], [1], [0, 0, 0, 1, 1, 1], [0], [0]>} : vector<8x16x32xbf16>, vector<8x16x32xbf16>, vector<8x16x16xf32> -> vector<8x16x16xf32>
    "tpu.trace_stop"() : () -> ()
    %cst_25 = arith.constant 0.176776692 : f32
    %58 = vector.broadcast %cst_25 : f32 to vector<8x16x16xf32>
    %59 = arith.mulf %57, %58 : vector<8x16x16xf32>
    %60 = vector.shape_cast %54 : vector<16x16xf32> to vector<1x16x16xf32>
    %61 = vector.broadcast %60 : vector<1x16x16xf32> to vector<8x16x16xf32>
    %62 = arith.addf %59, %61 : vector<8x16x16xf32>
    %cst_26 = arith.constant dense<0xFF800000> : vector<8x16xf32>
    %63 = vector.multi_reduction <maximumf>, %62, %cst_26 [2] : vector<8x16x16xf32> to vector<8x16xf32>
    %64 = vector.shape_cast %63 : vector<8x16xf32> to vector<8x16x1xf32>
    %65 = vector.broadcast %64 : vector<8x16x1xf32> to vector<8x16x16xf32>
    %66 = arith.subf %62, %65 : vector<8x16x16xf32>
    %67 = math.exp %66 : vector<8x16x16xf32>
    %cst_27 = arith.constant dense<0.000000e+00> : vector<8x16xf32>
    %68 = vector.multi_reduction <add>, %67, %cst_27 [2] : vector<8x16x16xf32> to vector<8x16xf32>
    %69 = vector.shape_cast %68 : vector<8x16xf32> to vector<8x16x1xf32>
    %70 = tpu.reciprocal %69 {approx = true} : vector<8x16x1xf32> -> vector<8x16x1xf32>
    %71 = vector.broadcast %70 : vector<8x16x1xf32> to vector<8x16x16xf32>
    %72 = arith.mulf %67, %71 : vector<8x16x16xf32>
    %73 = arith.truncf %72 : vector<8x16x16xf32> to vector<8x16x16xbf16>
    %74 = arith.truncf %48 : vector<8x16x32xf32> to vector<8x16x32xbf16>
    "tpu.trace_start"() <{level = 10 : i32, message = "nts,nsd->ntd"}> : () -> ()
    %cst_28 = arith.constant dense<0.000000e+00> : vector<8x16x32xf32>
    %75 = tpu.matmul %73, %74, %cst_28 {dimension_numbers = #tpu.dot_dimension_numbers<[2], [1], [1], [2], [0, 0, 0, 1, 1, 2], [0], [0]>} : vector<8x16x16xbf16>, vector<8x16x32xbf16>, vector<8x16x32xf32> -> vector<8x16x32xf32>
    "tpu.trace_stop"() : () -> ()
    %76 = arith.truncf %75 : vector<8x16x32xf32> to vector<8x16x32xbf16>
    %c0_29 = arith.constant 0 : index
    %c0_30 = arith.constant 0 : index
    %c0_31 = arith.constant 0 : index
    %77 = vector.load %arg6[%c0_29, %c0_30, %c0_31] : memref<4x32x128xbf16, #tpu.memory_space<vmem>>, vector<4x32x128xbf16>
    %78 = vector.shape_cast %77 : vector<4x32x128xbf16> to vector<1x4x32x128xbf16>
    %79 = vector.shape_cast %78 : vector<1x4x32x128xbf16> to vector<1x4x32x128xbf16>
    %80 = vector.broadcast %79 : vector<1x4x32x128xbf16> to vector<2x4x32x128xbf16>
    %81 = vector.shape_cast %80 : vector<2x4x32x128xbf16> to vector<8x32x128xbf16>
    "tpu.trace_start"() <{level = 10 : i32, message = "ntd,ndc->ntc"}> : () -> ()
    %cst_32 = arith.constant dense<0.000000e+00> : vector<8x16x128xf32>
    %82 = tpu.matmul %76, %81, %cst_32 {dimension_numbers = #tpu.dot_dimension_numbers<[2], [1], [1], [2], [0, 0, 0, 1, 1, 2], [0], [0]>} : vector<8x16x32xbf16>, vector<8x32x128xbf16>, vector<8x16x128xf32> -> vector<8x16x128xf32>
    "tpu.trace_stop"() : () -> ()
    %83 = vector.shape_cast %82 : vector<8x16x128xf32> to vector<2x4x16x128xf32>
    %cst_33 = arith.constant dense<0.000000e+00> : vector<2x16x128xf32>
    %84 = vector.multi_reduction <add>, %83, %cst_33 [1] : vector<2x4x16x128xf32> to vector<2x16x128xf32>
    %85 = vector.shape_cast %84 : vector<2x16x128xf32> to vector<32x128xf32>
    %c0_34 = arith.constant 0 : index
    %c0_35 = arith.constant 0 : index
    %86 = vector.load %arg7[%c0_34, %c0_35] : memref<1x128xf32, #tpu.memory_space<vmem>>, vector<1x128xf32>
    %87 = vector.broadcast %86 : vector<1x128xf32> to vector<32x128xf32>
    %88 = arith.addf %85, %87 : vector<32x128xf32>
    %89 = arith.addf %1, %88 : vector<32x128xf32>
    %c0_36 = arith.constant 0 : index
    %c0_37 = arith.constant 0 : index
    %90 = vector.load %arg8[%c0_36, %c0_37] : memref<1x128xf32, #tpu.memory_space<vmem>>, vector<1x128xf32>
    %c0_38 = arith.constant 0 : index
    %c0_39 = arith.constant 0 : index
    %91 = vector.load %arg9[%c0_38, %c0_39] : memref<1x128xf32, #tpu.memory_space<vmem>>, vector<1x128xf32>
    %cst_40 = arith.constant dense<0.000000e+00> : vector<32xf32>
    %92 = vector.multi_reduction <add>, %89, %cst_40 [1] : vector<32x128xf32> to vector<32xf32>
    %93 = vector.shape_cast %92 : vector<32xf32> to vector<32x1xf32>
    %cst_41 = arith.constant 1.280000e+02 : f32
    %94 = vector.broadcast %cst_41 : f32 to vector<32x1xf32>
    %95 = arith.divf %93, %94 : vector<32x1xf32>
    %96 = vector.broadcast %95 : vector<32x1xf32> to vector<32x128xf32>
    %97 = arith.subf %89, %96 : vector<32x128xf32>
    %98 = arith.mulf %97, %97 : vector<32x128xf32>
    %cst_42 = arith.constant dense<0.000000e+00> : vector<32xf32>
    %99 = vector.multi_reduction <add>, %98, %cst_42 [1] : vector<32x128xf32> to vector<32xf32>
    %100 = vector.shape_cast %99 : vector<32xf32> to vector<32x1xf32>
    %cst_43 = arith.constant 1.280000e+02 : f32
    %101 = vector.broadcast %cst_43 : f32 to vector<32x1xf32>
    %102 = arith.divf %100, %101 : vector<32x1xf32>
    %103 = vector.broadcast %95 : vector<32x1xf32> to vector<32x128xf32>
    %104 = arith.subf %89, %103 : vector<32x128xf32>
    %cst_44 = arith.constant 9.99999974E-6 : f32
    %105 = vector.broadcast %cst_44 : f32 to vector<32x1xf32>
    %106 = arith.addf %102, %105 : vector<32x1xf32>
    %107 = math.rsqrt %106 : vector<32x1xf32>
    %108 = vector.broadcast %107 : vector<32x1xf32> to vector<32x128xf32>
    %109 = arith.mulf %104, %108 : vector<32x128xf32>
    %110 = vector.broadcast %90 : vector<1x128xf32> to vector<32x128xf32>
    %111 = arith.mulf %109, %110 : vector<32x128xf32>
    %112 = vector.broadcast %91 : vector<1x128xf32> to vector<32x128xf32>
    %113 = arith.addf %111, %112 : vector<32x128xf32>
    %114 = arith.truncf %113 : vector<32x128xf32> to vector<32x128xbf16>
    %c0_45 = arith.constant 0 : index
    %c0_46 = arith.constant 0 : index
    %115 = vector.load %arg10[%c0_45, %c0_46] : memref<128x512xbf16, #tpu.memory_space<vmem>>, vector<128x512xbf16>
    %cst_47 = arith.constant dense<0.000000e+00> : vector<32x512xf32>
    %116 = tpu.matmul %114, %115, %cst_47 {dimension_numbers = #tpu.dot_dimension_numbers<[1], [0], [0], [1], [0, 0, 1, 1], [], []>} : vector<32x128xbf16>, vector<128x512xbf16>, vector<32x512xf32> -> vector<32x512xf32>
    %c0_48 = arith.constant 0 : index
    %c0_49 = arith.constant 0 : index
    %117 = vector.load %arg11[%c0_48, %c0_49] : memref<1x512xf32, #tpu.memory_space<vmem>>, vector<1x512xf32>
    %118 = vector.broadcast %117 : vector<1x512xf32> to vector<32x512xf32>
    %119 = arith.addf %116, %118 : vector<32x512xf32>
    %cst_50 = arith.constant 0.000000e+00 : f32
    %120 = vector.broadcast %cst_50 : f32 to vector<32x512xf32>
    %121 = arith.maximumf %119, %120 : vector<32x512xf32>
    %122 = arith.truncf %121 : vector<32x512xf32> to vector<32x512xbf16>
    %c0_51 = arith.constant 0 : index
    %c0_52 = arith.constant 0 : index
    %123 = vector.load %arg12[%c0_51, %c0_52] : memref<512x128xbf16, #tpu.memory_space<vmem>>, vector<512x128xbf16>
    %cst_53 = arith.constant dense<0.000000e+00> : vector<32x128xf32>
    %124 = tpu.matmul %122, %123, %cst_53 {dimension_numbers = #tpu.dot_dimension_numbers<[1], [0], [0], [1], [0, 0, 1, 1], [], []>} : vector<32x512xbf16>, vector<512x128xbf16>, vector<32x128xf32> -> vector<32x128xf32>
    %c0_54 = arith.constant 0 : index
    %c0_55 = arith.constant 0 : index
    %125 = vector.load %arg13[%c0_54, %c0_55] : memref<1x128xf32, #tpu.memory_space<vmem>>, vector<1x128xf32>
    %126 = vector.broadcast %125 : vector<1x128xf32> to vector<32x128xf32>
    %127 = arith.addf %124, %126 : vector<32x128xf32>
    %128 = arith.addf %89, %127 : vector<32x128xf32>
    %129 = vector.shape_cast %128 : vector<32x128xf32> to vector<2x16x128xf32>
    %c0_56 = arith.constant 0 : index
    %c0_57 = arith.constant 0 : index
    %c0_58 = arith.constant 0 : index
    %130 = vector.load %arg14[%c0_56, %c0_57, %c0_58] : memref<2x16x128xf32, #tpu.memory_space<vmem>>, vector<2x16x128xf32>
    tpu.vector_store %arg14[%c0_56, %c0_57, %c0_58], %129 {strides = array<i32>} : memref<2x16x128xf32, #tpu.memory_space<vmem>>, vector<2x16x128xf32>,
    return
  }
}

</mosaic_0001>

<bundles_post_ra>
// kernel: tpu_custom_call.1
= control target key start
LH: loop header
LB: loop body
LE: loop exit
PB: predicated region body
PF: predicated region fallthrough
CT: control target
= control target key end

     0   :  { %v5564_v6 = vmov 0.0   ;;  %s7340_s0 = inlined_call_operand.vmem [shape: f32[2,16,128], index: 0, kind: input, shape index: {}]   ;;  %s7341_s1 = inlined_call_operand.vmem [shape: f32[1,128], index: 1, kind: input, shape index: {}]   ;;  %s7342_s2 = inlined_call_operand.vmem [shape: f32[1,128], index: 2, kind: input, shape index: {}]   ;;  %s7343_s3 = inlined_call_operand.vmem [shape: bf16[4,128,32], index: 3, kind: input, shape index: {}]   ;;  %s7344_s4 = inlined_call_operand.vmem [shape: bf16[4,128,32], index: 4, kind: input, shape index: {}]   ;;  %s7345_s5 = inlined_call_operand.vmem [shape: bf16[4,128,32], index: 5, kind: input, shape index: {}]   ;;  %s7346_s6 = inlined_call_operand.vmem [shape: bf16[4,32,128], index: 6, kind: input, shape index: {}]   ;;  %s7347_s7 = inlined_call_operand.vmem [shape: f32[1,128], index: 7, kind: input, shape index: {}]   ;;  %s7348_s8 = inlined_call_operand.vmem [shape: f32[1,128], index: 8, kind: input, shape index: {}]   ;;  %s7349_s9 = inlined_call_operand.vmem [shape: f32[1,128], index: 9, kind: input, shape index: {}]   ;;  %s7350_s10 = inlined_call_operand.vmem [shape: bf16[128,512], index: 10, kind: input, shape index: {}]   ;;  %s7351_s11 = inlined_call_operand.vmem [shape: f32[1,512], index: 11, kind: input, shape index: {}]   ;;  %s7352_s12 = inlined_call_operand.vmem [shape: bf16[512,128], index: 12, kind: input, shape index: {}]   ;;  %s7353_s13 = inlined_call_operand.vmem [shape: f32[1,128], index: 13, kind: input, shape index: {}]   ;;  %s7354_s14 = inlined_call_operand.hbm [shape: f32[2,16,128], index: 14, kind: output, shape index: {}]  }
   0x1   :  { %v49_v0 = vld [vmem:[%s7340_s0] sm:$0xff]  ;;  %v51_v1 = vld [vmem:[%s7340_s0 + $0x10] sm:$0xff]  ;;  %v50_v2 = vld [vmem:[%s7340_s0 + $0x8] sm:$0xff]  ;;  %4627 = vmatprep.subr.bf16.mxu0 %v5564_v6  ;;  %4647 = vmatprep.subr.bf16.mxu1 %v5564_v6 }
   0x2   :  { %55 = vadd.xlane.f32.xlu0 %v49_v0  ;;  %59 = vadd.xlane.f32.xlu1 %v51_v1  ;;  %v52_v3 = vld [vmem:[%s7340_s0 + $0x18] sm:$0xff] }
   0x3   :  { %v5661_v4 = vld [vmem:[%s7343_s3 + $0x38] sm:$0xff]  }
   0x4   :  { %v5666_v5 = vld [vmem:[%s7343_s3 + $0x78] sm:$0xff]   ;;  %4628 = vmatpush3.bf16.msra.mxu0 %v5661_v4 }
   0x5   :  { %4648 = vmatpush3.bf16.msra.mxu1 %v5666_v5  ;;  %4629 = vmatprep.subr.bf16.mxu0 %v5564_v6 }
   0x6   :  { %57 = vadd.xlane.f32.xlu0 %v50_v2  ;;  %61 = vadd.xlane.f32.xlu1 %v52_v3 }
   0x7   :  { %4649 = vmatprep.subr.bf16.mxu1 %v5564_v6 }
   0x8   :  { %19 = vsyncpa [#allocation3], 0  ;;  %v5693_v23 = vld [vmem:[%s7343_s3 + $0x30] sm:$0xff]   ;;  %v5707_v25 = vld [vmem:[%s7343_s3 + $0x28] sm:$0xff]   ;;  %vm5565_vm0 = vmmov 0   ;;  %vm1899_vm1 = vcmask 261120  }
   0x9   :  { %v5698_v24 = vld [vmem:[%s7343_s3 + $0x70] sm:$0xff]   ;;  %4630 = vmatpush3.bf16.msra.mxu0 %v5693_v23  ;;  %v5712_v26 = vld [vmem:[%s7343_s3 + $0x68] sm:$0xff]   ;;  %v5721_v27 = vld [vmem:[%s7343_s3 + $0x20] sm:$0xff]   ;;  %4643 = vmatprep.mubr.msk.bf16.mxu0 %vm5565_vm0, %v5564_v6  ;;  %vm2308_vm4 = vcmask 130048  }
   0xa   :  { %4650 = vmatpush3.bf16.msra.mxu1 %v5698_v24  ;;  %4631 = vmatprep.subr.bf16.mxu0 %v5564_v6  ;;  %v5726_v28 = vld [vmem:[%s7343_s3 + $0x60] sm:$0xff]   ;;  %v5735_v29 = vld [vmem:[%s7343_s3 + $0x18] sm:$0xff]   ;;  %v5749_v31 = vld [vmem:[%s7343_s3 + $0x10] sm:$0xff]  }
   0xb   :  { %4651 = vmatprep.subr.bf16.mxu1 %v5564_v6  ;;  %v5740_v30 = vld [vmem:[%s7343_s3 + $0x58] sm:$0xff]   ;;  %v5754_v32 = vld [vmem:[%s7343_s3 + $0x50] sm:$0xff]   ;;  %v5763_v33 = vld [vmem:[%s7343_s3 + $0x8] sm:$0xff]   ;;  %4663 = vmatprep.mubr.msk.bf16.mxu1 %vm5565_vm0, %v5564_v6 }
   0xc   :  { %v5768_v34 = vld [vmem:[%s7343_s3 + $0x48] sm:$0xff]   ;;  %v5777_v35 = vld [vmem:[%s7343_s3] sm:$0xff]  }
   0xd   :  { %4632 = vmatpush3.bf16.msra.mxu0 %v5707_v25  ;;  %v5782_v36 = vld [vmem:[%s7343_s3 + $0x40] sm:$0xff]  }
   0xe   :  { %4652 = vmatpush3.bf16.msra.mxu1 %v5712_v26  ;;  %4633 = vmatprep.subr.bf16.mxu0 %v5564_v6  ;;  %v4101_v51 = vld [vmem:[%s7341_s1] ss:$0 sm:$0xff] }
   0xf   :  { %4653 = vmatprep.subr.bf16.mxu1 %v5564_v6  ;;  %v4102_v56 = vld [vmem:[%s7342_s2] ss:$0 sm:$0xff] }
  0x11   :  { %4634 = vmatpush3.bf16.msra.mxu0 %v5721_v27 }
  0x12   :  { %4654 = vmatpush3.bf16.msra.mxu1 %v5726_v28  ;;  %4635 = vmatprep.subr.bf16.mxu0 %v5564_v6 }
  0x13   :  { %4655 = vmatprep.subr.bf16.mxu1 %v5564_v6 }
  0x15   :  { %4636 = vmatpush3.bf16.msra.mxu0 %v5735_v29 }
  0x16   :  { %4656 = vmatpush3.bf16.msra.mxu1 %v5740_v30  ;;  %4637 = vmatprep.subr.bf16.mxu0 %v5564_v6 }
  0x17   :  { %4657 = vmatprep.subr.bf16.mxu1 %v5564_v6 }
  0x19   :  { %4638 = vmatpush3.bf16.msra.mxu0 %v5749_v31 }
  0x1a   :  { %4658 = vmatpush3.bf16.msra.mxu1 %v5754_v32  ;;  %4639 = vmatprep.subr.bf16.mxu0 %v5564_v6 }
  0x1b   :  { %4659 = vmatprep.subr.bf16.mxu1 %v5564_v6 }
  0x1d   :  { %4640 = vmatpush3.bf16.msra.mxu0 %v5763_v33 }
  0x1e   :  { %4660 = vmatpush3.bf16.msra.mxu1 %v5768_v34  ;;  %4641 = vmatprep.subr.bf16.mxu0 %v5564_v6 }
  0x1f   :  { %4661 = vmatprep.subr.bf16.mxu1 %v5564_v6 }
  0x21   :  { %4642 = vmatpush3.bf16.msra.mxu0 %v5777_v35 }
  0x22   :  { %4662 = vmatpush3.bf16.msra.mxu1 %v5782_v36  ;;  %4667 = vmatprep.subr.bf16.mxu0 %v5564_v6 }
  0x23   :  { %4687 = vmatprep.subr.bf16.mxu1 %v5564_v6 }
  0x8b   :  { %v56_v7 = vpop.xlane.xlu0 %55  ;;  %v60_v8 = vpop.xlane.xlu1 %59 }
  0x8c   :  { %v64_v9 = vmul.f32 0.0078125, %v56_v7  ;;  %v66_v10 = vmul.f32 0.0078125, %v60_v8 }
  0x8e   :  { %v5674_v11 = vsub.f32 %v49_v0, %v64_v9  ;;  %v5676_v12 = vsub.f32 %v51_v1, %v66_v10  ;;  %v5805_v1 = vld [vmem:[%s7343_s3 + $0xb8] sm:$0xff]   ;;  %v5821_v9 = vld [vmem:[%s7343_s3 + $0xb0] sm:$0xff]  }
  0x8f   :  { %v58_v13 = vpop.xlane.xlu0 %57  ;;  %v62_v14 = vpop.xlane.xlu1 %61  ;;  %v5826_v10 = vld [vmem:[%s7343_s3 + $0xf0] sm:$0xff]  }
  0x90   :  { %v65_v15 = vmul.f32 0.0078125, %v58_v13  ;;  %v72_v16 = vmul.f32 %v5674_v11, %v5674_v11  ;;  %v67_v17 = vmul.f32 0.0078125, %v62_v14  ;;  %v74_v20 = vmul.f32 %v5676_v12, %v5676_v12  ;;  %v5846_v13 = vld [vmem:[%s7343_s3 + $0xe8] sm:$0xff]   ;;  %v5855_v14 = vld [vmem:[%s7343_s3 + $0xa0] sm:$0xff]  }
  0x92   :  { %v5680_v18 = vsub.f32 %v50_v2, %v65_v15  ;;  %76 = vadd.xlane.f32.xlu0 %v72_v16  ;;  %v5682_v19 = vsub.f32 %v52_v3, %v67_v17  ;;  %v5810_v2 = vld [vmem:[%s7343_s3 + $0xf8] sm:$0xff]   ;;  %v5860_v15 = vld [vmem:[%s7343_s3 + $0xe0] sm:$0xff]  }
  0x93   :  { %v5869_v16 = vld [vmem:[%s7343_s3 + $0x98] sm:$0xff]  }
  0x94   :  { %v73_v21 = vmul.f32 %v5680_v18, %v5680_v18  ;;  %v75_v22 = vmul.f32 %v5682_v19, %v5682_v19  ;;  %v5874_v17 = vld [vmem:[%s7343_s3 + $0xd8] sm:$0xff]  }
  0x96   :  { %80 = vadd.xlane.f32.xlu0 %v74_v20  ;;  %78 = vadd.xlane.f32.xlu1 %v73_v21  ;;  %v5897_v20 = vld [vmem:[%s7343_s3 + $0x88] sm:$0xff]  }
  0x97   :  { %v5902_v21 = vld [vmem:[%s7343_s3 + $0xc8] sm:$0xff]  }
  0x9a   :  { %82 = vadd.xlane.f32.xlu1 %v75_v22  ;;  %v5911_v22 = vld [vmem:[%s7343_s3 + $0x80] sm:$0xff]  }
 0x11b   :  { %v77_v37 = vpop.xlane.xlu0 %76 }
 0x11c   :  { %v84_v38 = vmul.f32 0.0078125, %v77_v37  ;;  %v5916_v37 = vld [vmem:[%s7343_s3 + $0xc0] sm:$0xff]  }
 0x11e   :  { %v88_v39 = vadd.f32 1e-05, %v84_v38  ;;  %v6119_v38 = vld [vmem:[%s7344_s4 + $0xb8] sm:$0xff]  }
 0x11f   :  { %v79_v40 = vpop.xlane.xlu1 %78  ;;  %v81_v41 = vpop.xlane.xlu0 %80 }
 0x120   :  { %5458 = vrsqrt.f32 %v88_v39  ;;  %v85_v42 = vmul.f32 0.0078125, %v79_v40  ;;  %v86_v43 = vmul.f32 0.0078125, %v81_v41  ;;  %v6124_v39 = vld [vmem:[%s7344_s4 + $0xf8] sm:$0xff]   ;;  %v6135_v40 = vld [vmem:[%s7344_s4 + $0xb0] sm:$0xff]  }
 0x121   :  { %v6140_v41 = vld [vmem:[%s7344_s4 + $0xf0] sm:$0xff]  }
 0x122   :  { %v89_v44 = vadd.f32 1e-05, %v85_v42  ;;  %v90_v45 = vadd.f32 1e-05, %v86_v43  ;;  %v6153_v42 = vld [vmem:[%s7344_s4 + $0xa8] sm:$0xff]  }
 0x123   :  { %v83_v46 = vpop.xlane.xlu1 %82  ;;  %v6158_v43 = vld [vmem:[%s7344_s4 + $0xe8] sm:$0xff]  }
 0x124   :  { %5460 = vrsqrt.f32 %v89_v44  ;;  %v87_v47 = vmul.f32 0.0078125, %v83_v46  ;;  %v6167_v44 = vld [vmem:[%s7344_s4 + $0xa0] sm:$0xff]   ;;  %v6181_v46 = vld [vmem:[%s7344_s4 + $0x98] sm:$0xff]  }
 0x125   :  { %5462 = vrsqrt.f32 %v90_v45  ;;  %v6172_v45 = vld [vmem:[%s7344_s4 + $0xe0] sm:$0xff]  }
 0x126   :  { %v91_v48 = vadd.f32 1e-05, %v87_v47  ;;  %v6186_v47 = vld [vmem:[%s7344_s4 + $0xd8] sm:$0xff]  }
 0x128   :  { %5464 = vrsqrt.f32 %v91_v48  ;;  %v6195_v48 = vld [vmem:[%s7344_s4 + $0x90] sm:$0xff]  }
 0x12d   :  { %v5459_v49 = vpop.eup %5458 }
 0x12e   :  { %v96_v50 = vmul.f32 %v5459_v49, %v5674_v11  ;;  %v6200_v49 = vld [vmem:[%s7344_s4 + $0xd0] sm:$0xff]  }
 0x130   :  { %v106_v54 = vmul.f32 %v4101_v51, %v96_v50  ;;  %v6209_v50 = vld [vmem:[%s7344_s4 + $0x88] sm:$0xff]  }
 0x131   :  { %v5461_v52 = vpop.eup %5460 }
 0x132   :  { %v5463_v53 = vpop.eup %5462  ;;  %v97_v55 = vmul.f32 %v5461_v52, %v5680_v18  ;;  %v116_v61 = vadd.f32 %v4102_v56, %v106_v54  ;;  %v5883_v18 = vld [vmem:[%s7343_s3 + $0x90] sm:$0xff]   ;;  %v6223_v52 = vld [vmem:[%s7344_s4 + $0x80] sm:$0xff]  }
 0x133   :  { %v98_v57 = vmul.f32 %v5463_v53, %v5676_v12  ;;  %v5841_v12 = vld [vmem:[%s7343_s3 + $0xa8] sm:$0xff]   ;;  %v6228_v53 = vld [vmem:[%s7344_s4 + $0xc0] sm:$0xff]  }
 0x134   :  { %v107_v58 = vmul.f32 %v4101_v51, %v97_v55 }
 0x135   :  { %v5465_v59 = vpop.eup %5464  ;;  %v108_v60 = vmul.f32 %v4101_v51, %v98_v57 }
 0x136   :  { %v117_v62 = vadd.f32 %v4102_v56, %v107_v58  ;;  %v99_v63 = vmul.f32 %v5465_v59, %v5682_v19  ;;  %v5888_v19 = vld [vmem:[%s7343_s3 + $0xd0] sm:$0xff]  }
 0x137   :  { %v118_v0 = vadd.f32 %v4102_v56, %v108_v60 }
 0x138   :  { %v5812_v3 = vpack.c.bf16 %v117_v62, %v116_v61  ;;  %v109_v7 = vmul.f32 %v4101_v51, %v99_v63  ;;  %v6214_v51 = vld [vmem:[%s7344_s4 + $0xc8] sm:$0xff]  }
 0x13a   :  { %v119_v8 = vadd.f32 %v4102_v56, %v109_v7  ;;  %4644 = vmatmul.mubr.bf16.vlgmr.msra.gmra.mxu0 %v5812_v3  ;;  %4664 = vmatmul.mubr.bf16.vlgmr.msra.gmra.mxu1 %v5812_v3 }
 0x13b   :  { %4668 = vmatpush3.bf16.msra.mxu0 %v5805_v1  ;;  %4688 = vmatpush3.bf16.msra.mxu1 %v5810_v2 }
 0x13c   :  { %v5828_v11 = vpack.c.bf16 %v119_v8, %v118_v0  ;;  %4669 = vmatprep.subr.bf16.mxu0 %v5564_v6  ;;  %4689 = vmatprep.subr.bf16.mxu1 %v5564_v6  ;;  %v6325_v0 = vld [vmem:[%s7345_s5 + $0x38] sm:$0xff]   ;;  %v6345_v8 = vld [vmem:[%s7345_s5 + $0x30] sm:$0xff]  }
 0x13d   :  { %4683 = vmatprep.mubr.msk.bf16.mxu0 %vm5565_vm0, %v5564_v6  ;;  %4703 = vmatprep.mubr.msk.bf16.mxu1 %vm5565_vm0, %v5564_v6 }
 0x13f   :  { %4670 = vmatpush3.bf16.msra.mxu0 %v5821_v9  ;;  %4690 = vmatpush3.bf16.msra.mxu1 %v5826_v10 }
 0x140   :  { %4671 = vmatprep.subr.bf16.mxu0 %v5564_v6  ;;  %4691 = vmatprep.subr.bf16.mxu1 %v5564_v6 }
 0x143   :  { %4672 = vmatpush3.bf16.msra.mxu0 %v5841_v12  ;;  %4692 = vmatpush3.bf16.msra.mxu1 %v5846_v13 }
 0x144   :  { %4673 = vmatprep.subr.bf16.mxu0 %v5564_v6  ;;  %4693 = vmatprep.subr.bf16.mxu1 %v5564_v6 }
 0x147   :  { %4674 = vmatpush3.bf16.msra.mxu0 %v5855_v14  ;;  %4694 = vmatpush3.bf16.msra.mxu1 %v5860_v15 }
 0x148   :  { %4675 = vmatprep.subr.bf16.mxu0 %v5564_v6  ;;  %4695 = vmatprep.subr.bf16.mxu1 %v5564_v6 }
 0x14b   :  { %4676 = vmatpush3.bf16.msra.mxu0 %v5869_v16  ;;  %4696 = vmatpush3.bf16.msra.mxu1 %v5874_v17 }
 0x14c   :  { %4677 = vmatprep.subr.bf16.mxu0 %v5564_v6  ;;  %4697 = vmatprep.subr.bf16.mxu1 %v5564_v6 }
 0x14f   :  { %4678 = vmatpush3.bf16.msra.mxu0 %v5883_v18  ;;  %4698 = vmatpush3.bf16.msra.mxu1 %v5888_v19 }
 0x150   :  { %4679 = vmatprep.subr.bf16.mxu0 %v5564_v6  ;;  %4699 = vmatprep.subr.bf16.mxu1 %v5564_v6 }
 0x153   :  { %4680 = vmatpush3.bf16.msra.mxu0 %v5897_v20  ;;  %4700 = vmatpush3.bf16.msra.mxu1 %v5902_v21 }
 0x154   :  { %4681 = vmatprep.subr.bf16.mxu0 %v5564_v6  ;;  %4701 = vmatprep.subr.bf16.mxu1 %v5564_v6 }
 0x157   :  { %4682 = vmatpush3.bf16.msra.mxu0 %v5911_v22  ;;  %4702 = vmatpush3.bf16.msra.mxu1 %v5916_v37 }
 0x158   :  { %4707 = vmatprep.subr.bf16.mxu0 %v5564_v6  ;;  %4727 = vmatprep.subr.bf16.mxu1 %v5564_v6 }
 0x15a   :  { %4684 = vmatmul.mubr.bf16.vlgmr.msra.gmra.mxu0 %v5812_v3  ;;  %4704 = vmatmul.mubr.bf16.vlgmr.msra.gmra.mxu1 %v5812_v3 }
 0x15b   :  { %4708 = vmatpush3.bf16.msra.mxu0 %v5661_v4  ;;  %4728 = vmatpush3.bf16.msra.mxu1 %v5666_v5  ;;  %v6001_v4 = vld [vmem:[%s7344_s4 + $0x38] sm:$0xff]  }
 0x15c   :  { %4709 = vmatprep.subr.bf16.mxu0 %v5564_v6  ;;  %4729 = vmatprep.subr.bf16.mxu1 %v5564_v6  ;;  %v6006_v5 = vld [vmem:[%s7344_s4 + $0x78] sm:$0xff]  }
 0x15d   :  { %4723 = vmatprep.mubr.msk.bf16.mxu0 %vm5565_vm0, %v5564_v6  ;;  %4743 = vmatprep.mubr.msk.bf16.mxu1 %vm5565_vm0, %v5564_v6 }
 0x15f   :  { %4710 = vmatpush3.bf16.msra.mxu0 %v5693_v23  ;;  %4730 = vmatpush3.bf16.msra.mxu1 %v5698_v24  ;;  %v6017_v23 = vld [vmem:[%s7344_s4 + $0x30] sm:$0xff]  }
 0x160   :  { %4711 = vmatprep.subr.bf16.mxu0 %v5564_v6  ;;  %4731 = vmatprep.subr.bf16.mxu1 %v5564_v6  ;;  %v6022_v24 = vld [vmem:[%s7344_s4 + $0x70] sm:$0xff]  }
 0x163   :  { %4712 = vmatpush3.bf16.msra.mxu0 %v5707_v25  ;;  %4732 = vmatpush3.bf16.msra.mxu1 %v5712_v26  ;;  %v6035_v25 = vld [vmem:[%s7344_s4 + $0x28] sm:$0xff]  }
 0x164   :  { %4713 = vmatprep.subr.bf16.mxu0 %v5564_v6  ;;  %4733 = vmatprep.subr.bf16.mxu1 %v5564_v6  ;;  %v6040_v26 = vld [vmem:[%s7344_s4 + $0x68] sm:$0xff]  }
 0x167   :  { %4714 = vmatpush3.bf16.msra.mxu0 %v5721_v27  ;;  %4734 = vmatpush3.bf16.msra.mxu1 %v5726_v28  ;;  %v6049_v27 = vld [vmem:[%s7344_s4 + $0x20] sm:$0xff]  }
 0x168   :  { %4715 = vmatprep.subr.bf16.mxu0 %v5564_v6  ;;  %4735 = vmatprep.subr.bf16.mxu1 %v5564_v6  ;;  %v6054_v28 = vld [vmem:[%s7344_s4 + $0x60] sm:$0xff]  }
 0x16b   :  { %4716 = vmatpush3.bf16.msra.mxu0 %v5735_v29  ;;  %4736 = vmatpush3.bf16.msra.mxu1 %v5740_v30  ;;  %v6063_v29 = vld [vmem:[%s7344_s4 + $0x18] sm:$0xff]  }
 0x16c   :  { %4717 = vmatprep.subr.bf16.mxu0 %v5564_v6  ;;  %4737 = vmatprep.subr.bf16.mxu1 %v5564_v6  ;;  %v6068_v30 = vld [vmem:[%s7344_s4 + $0x58] sm:$0xff]  }
 0x16f   :  { %4718 = vmatpush3.bf16.msra.mxu0 %v5749_v31  ;;  %4738 = vmatpush3.bf16.msra.mxu1 %v5754_v32  ;;  %v6077_v31 = vld [vmem:[%s7344_s4 + $0x10] sm:$0xff]  }
 0x170   :  { %4719 = vmatprep.subr.bf16.mxu0 %v5564_v6  ;;  %4739 = vmatprep.subr.bf16.mxu1 %v5564_v6  ;;  %v6082_v32 = vld [vmem:[%s7344_s4 + $0x50] sm:$0xff]  }
 0x173   :  { %4720 = vmatpush3.bf16.msra.mxu0 %v5763_v33  ;;  %4740 = vmatpush3.bf16.msra.mxu1 %v5768_v34  ;;  %v6091_v33 = vld [vmem:[%s7344_s4 + $0x8] sm:$0xff]  }
 0x174   :  { %4721 = vmatprep.subr.bf16.mxu0 %v5564_v6  ;;  %4741 = vmatprep.subr.bf16.mxu1 %v5564_v6  ;;  %v6096_v34 = vld [vmem:[%s7344_s4 + $0x48] sm:$0xff]  }
 0x177   :  { %4722 = vmatpush3.bf16.msra.mxu0 %v5777_v35  ;;  %4742 = vmatpush3.bf16.msra.mxu1 %v5782_v36  ;;  %v6105_v35 = vld [vmem:[%s7344_s4] sm:$0xff]  }
 0x178   :  { %4747 = vmatprep.subr.bf16.mxu0 %v5564_v6  ;;  %4767 = vmatprep.subr.bf16.mxu1 %v5564_v6  ;;  %v6110_v36 = vld [vmem:[%s7344_s4 + $0x40] sm:$0xff]  }
 0x17a   :  { %4724 = vmatmul.mubr.bf16.vlgmr.msra.gmra.mxu0 %v5828_v11  ;;  %4744 = vmatmul.mubr.bf16.vlgmr.msra.gmra.mxu1 %v5828_v11 }
 0x17b   :  { %4748 = vmatpush3.bf16.msra.mxu0 %v5805_v1  ;;  %4768 = vmatpush3.bf16.msra.mxu1 %v5810_v2  ;;  %v6330_v1 = vld [vmem:[%s7345_s5 + $0x78] sm:$0xff]  }
 0x17c   :  { %4749 = vmatprep.subr.bf16.mxu0 %v5564_v6  ;;  %4769 = vmatprep.subr.bf16.mxu1 %v5564_v6 }
 0x17d   :  { %4763 = vmatprep.mubr.msk.bf16.mxu0 %vm5565_vm0, %v5564_v6  ;;  %4783 = vmatprep.mubr.msk.bf16.mxu1 %vm5565_vm0, %v5564_v6 }
 0x17f   :  { %4750 = vmatpush3.bf16.msra.mxu0 %v5821_v9  ;;  %4770 = vmatpush3.bf16.msra.mxu1 %v5826_v10  ;;  %v6350_v9 = vld [vmem:[%s7345_s5 + $0x70] sm:$0xff]  }
 0x180   :  { %4751 = vmatprep.subr.bf16.mxu0 %v5564_v6  ;;  %4771 = vmatprep.subr.bf16.mxu1 %v5564_v6 }
 0x183   :  { %4752 = vmatpush3.bf16.msra.mxu0 %v5841_v12  ;;  %4772 = vmatpush3.bf16.msra.mxu1 %v5846_v13 }
 0x184   :  { %4753 = vmatprep.subr.bf16.mxu0 %v5564_v6  ;;  %4773 = vmatprep.subr.bf16.mxu1 %v5564_v6 }
 0x187   :  { %4754 = vmatpush3.bf16.msra.mxu0 %v5855_v14  ;;  %4774 = vmatpush3.bf16.msra.mxu1 %v5860_v15 }
 0x188   :  { %4755 = vmatprep.subr.bf16.mxu0 %v5564_v6  ;;  %4775 = vmatprep.subr.bf16.mxu1 %v5564_v6 }
 0x18b   :  { %4756 = vmatpush3.bf16.msra.mxu0 %v5869_v16  ;;  %4776 = vmatpush3.bf16.msra.mxu1 %v5874_v17  ;;  %v6371_v17 = vld [vmem:[%s7345_s5 + $0x28] sm:$0xff]  }
 0x18c   :  { %4757 = vmatprep.subr.bf16.mxu0 %v5564_v6  ;;  %4777 = vmatprep.subr.bf16.mxu1 %v5564_v6 }
 0x18f   :  { %4758 = vmatpush3.bf16.msra.mxu0 %v5883_v18  ;;  %4778 = vmatpush3.bf16.msra.mxu1 %v5888_v19  ;;  %v6376_v18 = vld [vmem:[%s7345_s5 + $0x68] sm:$0xff]  }
 0x190   :  { %4759 = vmatprep.subr.bf16.mxu0 %v5564_v6  ;;  %4779 = vmatprep.subr.bf16.mxu1 %v5564_v6 }
 0x193   :  { %4760 = vmatpush3.bf16.msra.mxu0 %v5897_v20  ;;  %4780 = vmatpush3.bf16.msra.mxu1 %v5902_v21  ;;  %v6385_v21 = vld [vmem:[%s7345_s5 + $0x20] sm:$0xff]  }
 0x194   :  { %4761 = vmatprep.subr.bf16.mxu0 %v5564_v6  ;;  %4781 = vmatprep.subr.bf16.mxu1 %v5564_v6 }
 0x197   :  { %4762 = vmatpush3.bf16.msra.mxu0 %v5911_v22  ;;  %4782 = vmatpush3.bf16.msra.mxu1 %v5916_v37  ;;  %v6390_v22 = vld [vmem:[%s7345_s5 + $0x60] sm:$0xff]   ;;  %v6399_v37 = vld [vmem:[%s7345_s5 + $0x18] sm:$0xff]  }
 0x198   :  { %4787 = vmatprep.subr.bf16.mxu0 %v5564_v6  ;;  %4807 = vmatprep.subr.bf16.mxu1 %v5564_v6 }
 0x19a   :  { %4764 = vmatmul.mubr.bf16.vlgmr.msra.gmra.mxu0 %v5828_v11  ;;  %4784 = vmatmul.mubr.bf16.vlgmr.msra.gmra.mxu1 %v5828_v11 }
 0x19b   :  { %4788 = vmatpush3.bf16.msra.mxu0 %v6001_v4  ;;  %4808 = vmatpush3.bf16.msra.mxu1 %v6006_v5 }
 0x19c   :  { %4789 = vmatprep.subr.bf16.mxu0 %v5564_v6  ;;  %4809 = vmatprep.subr.bf16.mxu1 %v5564_v6 }
 0x19d   :  { %4803 = vmatprep.mubr.msk.bf16.mxu0 %vm5565_vm0, %v5564_v6  ;;  %4823 = vmatprep.mubr.msk.bf16.mxu1 %vm5565_vm0, %v5564_v6 }
 0x19f   :  { %4790 = vmatpush3.bf16.msra.mxu0 %v6017_v23  ;;  %4810 = vmatpush3.bf16.msra.mxu1 %v6022_v24 }
 0x1a0   :  { %4791 = vmatprep.subr.bf16.mxu0 %v5564_v6  ;;  %4811 = vmatprep.subr.bf16.mxu1 %v5564_v6 }
 0x1a3   :  { %4792 = vmatpush3.bf16.msra.mxu0 %v6035_v25  ;;  %4812 = vmatpush3.bf16.msra.mxu1 %v6040_v26 }
 0x1a4   :  { %4793 = vmatprep.subr.bf16.mxu0 %v5564_v6  ;;  %4813 = vmatprep.subr.bf16.mxu1 %v5564_v6 }
 0x1a7   :  { %4794 = vmatpush3.bf16.msra.mxu0 %v6049_v27  ;;  %4814 = vmatpush3.bf16.msra.mxu1 %v6054_v28 }
 0x1a8   :  { %4795 = vmatprep.subr.bf16.mxu0 %v5564_v6  ;;  %4815 = vmatprep.subr.bf16.mxu1 %v5564_v6 }
 0x1ab   :  { %4796 = vmatpush3.bf16.msra.mxu0 %v6063_v29  ;;  %4816 = vmatpush3.bf16.msra.mxu1 %v6068_v30 }
 0x1ac   :  { %4797 = vmatprep.subr.bf16.mxu0 %v5564_v6  ;;  %4817 = vmatprep.subr.bf16.mxu1 %v5564_v6 }
 0x1af   :  { %4798 = vmatpush3.bf16.msra.mxu0 %v6077_v31  ;;  %4818 = vmatpush3.bf16.msra.mxu1 %v6082_v32 }
 0x1b0   :  { %4799 = vmatprep.subr.bf16.mxu0 %v5564_v6  ;;  %4819 = vmatprep.subr.bf16.mxu1 %v5564_v6 }
 0x1b3   :  { %4800 = vmatpush3.bf16.msra.mxu0 %v6091_v33  ;;  %4820 = vmatpush3.bf16.msra.mxu1 %v6096_v34 }
 0x1b4   :  { %4801 = vmatprep.subr.bf16.mxu0 %v5564_v6  ;;  %4821 = vmatprep.subr.bf16.mxu1 %v5564_v6 }
 0x1b7   :  { %4802 = vmatpush3.bf16.msra.mxu0 %v6105_v35  ;;  %4822 = vmatpush3.bf16.msra.mxu1 %v6110_v36 }
 0x1b8   :  { %4827 = vmatprep.subr.bf16.mxu0 %v5564_v6  ;;  %4847 = vmatprep.subr.bf16.mxu1 %v5564_v6 }
 0x1ba   :  { %4804 = vmatmul.mubr.bf16.vlgmr.msra.gmra.mxu0 %v5812_v3  ;;  %4824 = vmatmul.mubr.bf16.vlgmr.msra.gmra.mxu1 %v5812_v3 }
 0x1bb   :  { %4828 = vmatpush3.bf16.msra.mxu0 %v6119_v38  ;;  %4848 = vmatpush3.bf16.msra.mxu1 %v6124_v39 }
 0x1bc   :  { %4829 = vmatprep.subr.bf16.mxu0 %v5564_v6  ;;  %4849 = vmatprep.subr.bf16.mxu1 %v5564_v6 }
 0x1bd   :  { %4843 = vmatprep.mubr.msk.bf16.mxu0 %vm5565_vm0, %v5564_v6  ;;  %4863 = vmatprep.mubr.msk.bf16.mxu1 %vm5565_vm0, %v5564_v6 }
 0x1bf   :  { %4830 = vmatpush3.bf16.msra.mxu0 %v6135_v40  ;;  %4850 = vmatpush3.bf16.msra.mxu1 %v6140_v41 }
 0x1c0   :  { %4831 = vmatprep.subr.bf16.mxu0 %v5564_v6  ;;  %4851 = vmatprep.subr.bf16.mxu1 %v5564_v6 }
 0x1c3   :  { %4832 = vmatpush3.bf16.msra.mxu0 %v6153_v42  ;;  %4852 = vmatpush3.bf16.msra.mxu1 %v6158_v43 }
 0x1c4   :  { %4833 = vmatprep.subr.bf16.mxu0 %v5564_v6  ;;  %4853 = vmatprep.subr.bf16.mxu1 %v5564_v6 }
 0x1c7   :  { %4834 = vmatpush3.bf16.msra.mxu0 %v6167_v44  ;;  %4854 = vmatpush3.bf16.msra.mxu1 %v6172_v45 }
 0x1c8   :  { %4835 = vmatprep.subr.bf16.mxu0 %v5564_v6  ;;  %4855 = vmatprep.subr.bf16.mxu1 %v5564_v6 }
 0x1cb   :  { %4836 = vmatpush3.bf16.msra.mxu0 %v6181_v46  ;;  %4856 = vmatpush3.bf16.msra.mxu1 %v6186_v47 }
 0x1cc   :  { %4837 = vmatprep.subr.bf16.mxu0 %v5564_v6  ;;  %4857 = vmatprep.subr.bf16.mxu1 %v5564_v6 }
 0x1cf   :  { %4838 = vmatpush3.bf16.msra.mxu0 %v6195_v48  ;;  %4858 = vmatpush3.bf16.msra.mxu1 %v6200_v49 }
 0x1d0   :  { %4839 = vmatprep.subr.bf16.mxu0 %v5564_v6  ;;  %4859 = vmatprep.subr.bf16.mxu1 %v5564_v6 }
 0x1d3   :  { %4840 = vmatpush3.bf16.msra.mxu0 %v6209_v50  ;;  %4860 = vmatpush3.bf16.msra.mxu1 %v6214_v51 }
 0x1d4   :  { %4841 = vmatprep.subr.bf16.mxu0 %v5564_v6  ;;  %4861 = vmatprep.subr.bf16.mxu1 %v5564_v6 }
 0x1d7   :  { %4842 = vmatpush3.bf16.msra.mxu0 %v6223_v52  ;;  %4862 = vmatpush3.bf16.msra.mxu1 %v6228_v53 }
 0x1d8   :  { %4867 = vmatprep.subr.bf16.mxu0 %v5564_v6  ;;  %4887 = vmatprep.subr.bf16.mxu1 %v5564_v6 }
 0x1da   :  { %4844 = vmatmul.mubr.bf16.vlgmr.msra.gmra.mxu0 %v5812_v3  ;;  %4864 = vmatmul.mubr.bf16.vlgmr.msra.gmra.mxu1 %v5812_v3 }
 0x1db   :  { %4868 = vmatpush3.bf16.msra.mxu0 %v6001_v4  ;;  %4888 = vmatpush3.bf16.msra.mxu1 %v6006_v5  ;;  %v6404_v4 = vld [vmem:[%s7345_s5 + $0x58] sm:$0xff]   ;;  %v6413_v5 = vld [vmem:[%s7345_s5 + $0x10] sm:$0xff]  }
 0x1dc   :  { %4869 = vmatprep.subr.bf16.mxu0 %v5564_v6  ;;  %4889 = vmatprep.subr.bf16.mxu1 %v5564_v6 }
 0x1dd   :  { %4883 = vmatprep.mubr.msk.bf16.mxu0 %vm5565_vm0, %v5564_v6  ;;  %4903 = vmatprep.mubr.msk.bf16.mxu1 %vm5565_vm0, %v5564_v6 }
 0x1df   :  { %4870 = vmatpush3.bf16.msra.mxu0 %v6017_v23  ;;  %4890 = vmatpush3.bf16.msra.mxu1 %v6022_v24  ;;  %v6418_v23 = vld [vmem:[%s7345_s5 + $0x50] sm:$0xff]   ;;  %v6427_v24 = vld [vmem:[%s7345_s5 + $0x8] sm:$0xff]  }
 0x1e0   :  { %4871 = vmatprep.subr.bf16.mxu0 %v5564_v6  ;;  %4891 = vmatprep.subr.bf16.mxu1 %v5564_v6 }
 0x1e3   :  { %4872 = vmatpush3.bf16.msra.mxu0 %v6035_v25  ;;  %4892 = vmatpush3.bf16.msra.mxu1 %v6040_v26  ;;  %v6432_v25 = vld [vmem:[%s7345_s5 + $0x48] sm:$0xff]   ;;  %v6441_v26 = vld [vmem:[%s7345_s5] sm:$0xff]  }
 0x1e4   :  { %4873 = vmatprep.subr.bf16.mxu0 %v5564_v6  ;;  %4893 = vmatprep.subr.bf16.mxu1 %v5564_v6 }
 0x1e7   :  { %4874 = vmatpush3.bf16.msra.mxu0 %v6049_v27  ;;  %4894 = vmatpush3.bf16.msra.mxu1 %v6054_v28  ;;  %v6446_v27 = vld [vmem:[%s7345_s5 + $0x40] sm:$0xff]   ;;  %v6455_v28 = vld [vmem:[%s7345_s5 + $0xb8] sm:$0xff]  }
 0x1e8   :  { %4875 = vmatprep.subr.bf16.mxu0 %v5564_v6  ;;  %4895 = vmatprep.subr.bf16.mxu1 %v5564_v6 }
 0x1eb   :  { %4876 = vmatpush3.bf16.msra.mxu0 %v6063_v29  ;;  %4896 = vmatpush3.bf16.msra.mxu1 %v6068_v30  ;;  %v6460_v29 = vld [vmem:[%s7345_s5 + $0xf8] sm:$0xff]  }
 0x1ec   :  { %4877 = vmatprep.subr.bf16.mxu0 %v5564_v6  ;;  %4897 = vmatprep.subr.bf16.mxu1 %v5564_v6 }
 0x1ef   :  { %4878 = vmatpush3.bf16.msra.mxu0 %v6077_v31  ;;  %4898 = vmatpush3.bf16.msra.mxu1 %v6082_v32  ;;  %v6475_v32 = vld [vmem:[%s7345_s5 + $0xb0] sm:$0xff]  }
 0x1f0   :  { %4879 = vmatprep.subr.bf16.mxu0 %v5564_v6  ;;  %4899 = vmatprep.subr.bf16.mxu1 %v5564_v6 }
 0x1f3   :  { %4880 = vmatpush3.bf16.msra.mxu0 %v6091_v33  ;;  %4900 = vmatpush3.bf16.msra.mxu1 %v6096_v34  ;;  %v6480_v33 = vld [vmem:[%s7345_s5 + $0xf0] sm:$0xff]  }
 0x1f4   :  { %4881 = vmatprep.subr.bf16.mxu0 %v5564_v6  ;;  %4901 = vmatprep.subr.bf16.mxu1 %v5564_v6 }
 0x1f7   :  { %4882 = vmatpush3.bf16.msra.mxu0 %v6105_v35  ;;  %4902 = vmatpush3.bf16.msra.mxu1 %v6110_v36 }
 0x1f8   :  { %4907 = vmatprep.subr.bf16.mxu0 %v5564_v6  ;;  %4927 = vmatprep.subr.bf16.mxu1 %v5564_v6 }
 0x1fa   :  { %4884 = vmatmul.mubr.bf16.vlgmr.msra.gmra.mxu0 %v5828_v11  ;;  %4904 = vmatmul.mubr.bf16.vlgmr.msra.gmra.mxu1 %v5828_v11  ;;  %v6276_v54 = vpop.f32.mrf.mxu0  ;;  %v6278_v55 = vpop.f32.mrf.mxu1 }
 0x1fb   :  { %4908 = vmatpush3.bf16.msra.mxu0 %v6119_v38  ;;  %4928 = vmatpush3.bf16.msra.mxu1 %v6124_v39 }
 0x1fc   :  { %v4645_v56 = vpop.f32.mrf.mxu0  ;;  %v4665_v57 = vpop.f32.mrf.mxu1  ;;  %4909 = vmatprep.subr.bf16.mxu0 %v5564_v6  ;;  %4929 = vmatprep.subr.bf16.mxu1 %v5564_v6 }
 0x1fd   :  { %4923 = vmatprep.mubr.msk.bf16.mxu0 %vm5565_vm0, %v5564_v6  ;;  %4943 = vmatprep.mubr.msk.bf16.mxu1 %vm5565_vm0, %v5564_v6  ;;  %v6576_v56 = vld [vmem:[%s7345_s5 + $0xc0] sm:$0xff]  }
 0x1fe   :  { %v6288_v58 = vpop.f32.mrf.mxu0  ;;  %v6290_v59 = vpop.f32.mrf.mxu1 }
 0x1ff   :  { %v1883_v60 = vpack.c.bf16 %v6288_v58, %v6276_v54  ;;  %v1884_v61 = vpack.c.bf16 %v6290_v59, %v6278_v55  ;;  %4910 = vmatpush3.bf16.msra.mxu0 %v6135_v40  ;;  %4930 = vmatpush3.bf16.msra.mxu1 %v6140_v41  ;;  %v6501_v41 = vld [vmem:[%s7345_s5 + $0xa8] sm:$0xff]  }
 0x200   :  { %v4646_v62 = vpop.f32.mrf.mxu0  ;;  %v4666_v63 = vpop.f32.mrf.mxu1  ;;  %4911 = vmatprep.subr.bf16.mxu0 %v5564_v6  ;;  %4931 = vmatprep.subr.bf16.mxu1 %v5564_v6 }
 0x203   :  { %4912 = vmatpush3.bf16.msra.mxu0 %v6153_v42  ;;  %4932 = vmatpush3.bf16.msra.mxu1 %v6158_v43  ;;  %v6506_v42 = vld [vmem:[%s7345_s5 + $0xe8] sm:$0xff]  }
 0x204   :  { %4913 = vmatprep.subr.bf16.mxu0 %v5564_v6  ;;  %4933 = vmatprep.subr.bf16.mxu1 %v5564_v6 }
 0x207   :  { %4914 = vmatpush3.bf16.msra.mxu0 %v6167_v44  ;;  %4934 = vmatpush3.bf16.msra.mxu1 %v6172_v45  ;;  %v6515_v45 = vld [vmem:[%s7345_s5 + $0xa0] sm:$0xff]  }
 0x208   :  { %4915 = vmatprep.subr.bf16.mxu0 %v5564_v6  ;;  %4935 = vmatprep.subr.bf16.mxu1 %v5564_v6 }
 0x20b   :  { %4916 = vmatpush3.bf16.msra.mxu0 %v6181_v46  ;;  %4936 = vmatpush3.bf16.msra.mxu1 %v6186_v47  ;;  %v6520_v46 = vld [vmem:[%s7345_s5 + $0xe0] sm:$0xff]   ;;  %v6529_v47 = vld [vmem:[%s7345_s5 + $0x98] sm:$0xff]  }
 0x20c   :  { %4917 = vmatprep.subr.bf16.mxu0 %v5564_v6  ;;  %4937 = vmatprep.subr.bf16.mxu1 %v5564_v6 }
 0x20f   :  { %4918 = vmatpush3.bf16.msra.mxu0 %v6195_v48  ;;  %4938 = vmatpush3.bf16.msra.mxu1 %v6200_v49  ;;  %v6534_v48 = vld [vmem:[%s7345_s5 + $0xd8] sm:$0xff]   ;;  %v6543_v49 = vld [vmem:[%s7345_s5 + $0x90] sm:$0xff]  }
 0x210   :  { %4919 = vmatprep.subr.bf16.mxu0 %v5564_v6  ;;  %4939 = vmatprep.subr.bf16.mxu1 %v5564_v6 }
 0x213   :  { %4920 = vmatpush3.bf16.msra.mxu0 %v6209_v50  ;;  %4940 = vmatpush3.bf16.msra.mxu1 %v6214_v51  ;;  %v6548_v50 = vld [vmem:[%s7345_s5 + $0xd0] sm:$0xff]   ;;  %v6557_v51 = vld [vmem:[%s7345_s5 + $0x88] sm:$0xff]  }
 0x214   :  { %4921 = vmatprep.subr.bf16.mxu0 %v5564_v6  ;;  %4941 = vmatprep.subr.bf16.mxu1 %v5564_v6 }
 0x217   :  { %4922 = vmatpush3.bf16.msra.mxu0 %v6223_v52  ;;  %4942 = vmatpush3.bf16.msra.mxu1 %v6228_v53  ;;  %v6562_v52 = vld [vmem:[%s7345_s5 + $0xc8] sm:$0xff]   ;;  %v6571_v53 = vld [vmem:[%s7345_s5 + $0x80] sm:$0xff]  }
 0x218   :  { %4947 = vmatprep.subr.bf16.mxu0 %v5564_v6  ;;  %4967 = vmatprep.subr.bf16.mxu1 %v5564_v6 }
 0x21a   :  { %v6334_v2 = vpop.f32.mrf.mxu0  ;;  %v6336_v7 = vpop.f32.mrf.mxu1  ;;  %4924 = vmatmul.mubr.bf16.vlgmr.msra.gmra.mxu0 %v5828_v11  ;;  %4944 = vmatmul.mubr.bf16.vlgmr.msra.gmra.mxu1 %v5828_v11 }
 0x21b   :  { %4948 = vmatpush3.bf16.msra.mxu0 %v6325_v0  ;;  %4968 = vmatpush3.bf16.msra.mxu1 %v6330_v1 }
 0x21c   :  { %v4685_v10 = vpop.f32.mrf.mxu0  ;;  %v4705_v12 = vpop.f32.mrf.mxu1  ;;  %4949 = vmatprep.subr.bf16.mxu0 %v5564_v6  ;;  %4969 = vmatprep.subr.bf16.mxu1 %v5564_v6 }
 0x21d   :  { %4963 = vmatprep.mubr.msk.bf16.mxu0 %vm5565_vm0, %v5564_v6  ;;  %4983 = vmatprep.mubr.msk.bf16.mxu1 %vm5565_vm0, %v5564_v6 }
 0x21e   :  { %v6358_v13 = vpop.f32.mrf.mxu0  ;;  %v6360_v14 = vpop.f32.mrf.mxu1 }
 0x21f   :  { %v1885_v15 = vpack.c.bf16 %v6358_v13, %v6334_v2  ;;  %v1886_v16 = vpack.c.bf16 %v6360_v14, %v6336_v7  ;;  %4950 = vmatpush3.bf16.msra.mxu0 %v6345_v8  ;;  %4970 = vmatpush3.bf16.msra.mxu1 %v6350_v9 }
 0x220   :  { %v4686_v19 = vpop.f32.mrf.mxu0  ;;  %v4706_v20 = vpop.f32.mrf.mxu1  ;;  %4951 = vmatprep.subr.bf16.mxu0 %v5564_v6  ;;  %4971 = vmatprep.subr.bf16.mxu1 %v5564_v6 }
 0x223   :  { %4952 = vmatpush3.bf16.msra.mxu0 %v6371_v17  ;;  %4972 = vmatpush3.bf16.msra.mxu1 %v6376_v18 }
 0x224   :  { %4953 = vmatprep.subr.bf16.mxu0 %v5564_v6  ;;  %4973 = vmatprep.subr.bf16.mxu1 %v5564_v6 }
 0x227   :  { %4954 = vmatpush3.bf16.msra.mxu0 %v6385_v21  ;;  %4974 = vmatpush3.bf16.msra.mxu1 %v6390_v22 }
 0x228   :  { %4955 = vmatprep.subr.bf16.mxu0 %v5564_v6  ;;  %4975 = vmatprep.subr.bf16.mxu1 %v5564_v6 }
 0x22b   :  { %4956 = vmatpush3.bf16.msra.mxu0 %v6399_v37  ;;  %4976 = vmatpush3.bf16.msra.mxu1 %v6404_v4 }
 0x22c   :  { %4957 = vmatprep.subr.bf16.mxu0 %v5564_v6  ;;  %4977 = vmatprep.subr.bf16.mxu1 %v5564_v6 }
 0x22f   :  { %4958 = vmatpush3.bf16.msra.mxu0 %v6413_v5  ;;  %4978 = vmatpush3.bf16.msra.mxu1 %v6418_v23 }
 0x230   :  { %4959 = vmatprep.subr.bf16.mxu0 %v5564_v6  ;;  %4979 = vmatprep.subr.bf16.mxu1 %v5564_v6 }
 0x233   :  { %4960 = vmatpush3.bf16.msra.mxu0 %v6427_v24  ;;  %4980 = vmatpush3.bf16.msra.mxu1 %v6432_v25 }
 0x234   :  { %4961 = vmatprep.subr.bf16.mxu0 %v5564_v6  ;;  %4981 = vmatprep.subr.bf16.mxu1 %v5564_v6 }
 0x237   :  { %4962 = vmatpush3.bf16.msra.mxu0 %v6441_v26  ;;  %4982 = vmatpush3.bf16.msra.mxu1 %v6446_v27 }
 0x238   :  { %4987 = vmatprep.subr.bf16.mxu0 %v5564_v6  ;;  %5007 = vmatprep.subr.bf16.mxu1 %v5564_v6 }
 0x23a   :  { %v6464_v30 = vpop.f32.mrf.mxu0  ;;  %v6466_v31 = vpop.f32.mrf.mxu1  ;;  %4964 = vmatmul.mubr.bf16.vlgmr.msra.gmra.mxu0 %v5812_v3  ;;  %4984 = vmatmul.mubr.bf16.vlgmr.msra.gmra.mxu1 %v5812_v3 }
 0x23b   :  { %4988 = vmatpush3.bf16.msra.mxu0 %v6455_v28  ;;  %5008 = vmatpush3.bf16.msra.mxu1 %v6460_v29 }
 0x23c   :  { %v4725_v34 = vpop.f32.mrf.mxu0  ;;  %v4745_v35 = vpop.f32.mrf.mxu1  ;;  %4989 = vmatprep.subr.bf16.mxu0 %v5564_v6  ;;  %5009 = vmatprep.subr.bf16.mxu1 %v5564_v6 }
 0x23d   :  { %5003 = vmatprep.mubr.msk.bf16.mxu0 %vm5565_vm0, %v5564_v6  ;;  %5023 = vmatprep.mubr.msk.bf16.mxu1 %vm5565_vm0, %v5564_v6 }
 0x23e   :  { %v6488_v36 = vpop.f32.mrf.mxu0  ;;  %v6490_v38 = vpop.f32.mrf.mxu1 }
 0x23f   :  { %v1887_v39 = vpack.c.bf16 %v6488_v36, %v6464_v30  ;;  %v1888_v40 = vpack.c.bf16 %v6490_v38, %v6466_v31  ;;  %4990 = vmatpush3.bf16.msra.mxu0 %v6475_v32  ;;  %5010 = vmatpush3.bf16.msra.mxu1 %v6480_v33 }
 0x240   :  { %v4726_v43 = vpop.f32.mrf.mxu0  ;;  %v4746_v44 = vpop.f32.mrf.mxu1  ;;  %4991 = vmatprep.subr.bf16.mxu0 %v5564_v6  ;;  %5011 = vmatprep.subr.bf16.mxu1 %v5564_v6 }
 0x243   :  { %4992 = vmatpush3.bf16.msra.mxu0 %v6501_v41  ;;  %5012 = vmatpush3.bf16.msra.mxu1 %v6506_v42 }
 0x244   :  { %4993 = vmatprep.subr.bf16.mxu0 %v5564_v6  ;;  %5013 = vmatprep.subr.bf16.mxu1 %v5564_v6 }
 0x247   :  { %4994 = vmatpush3.bf16.msra.mxu0 %v6515_v45  ;;  %5014 = vmatpush3.bf16.msra.mxu1 %v6520_v46 }
 0x248   :  { %4995 = vmatprep.subr.bf16.mxu0 %v5564_v6  ;;  %5015 = vmatprep.subr.bf16.mxu1 %v5564_v6 }
 0x24b   :  { %4996 = vmatpush3.bf16.msra.mxu0 %v6529_v47  ;;  %5016 = vmatpush3.bf16.msra.mxu1 %v6534_v48 }
 0x24c   :  { %4997 = vmatprep.subr.bf16.mxu0 %v5564_v6  ;;  %5017 = vmatprep.subr.bf16.mxu1 %v5564_v6 }
 0x24f   :  { %4998 = vmatpush3.bf16.msra.mxu0 %v6543_v49  ;;  %5018 = vmatpush3.bf16.msra.mxu1 %v6548_v50 }
 0x250   :  { %4999 = vmatprep.subr.bf16.mxu0 %v5564_v6  ;;  %5019 = vmatprep.subr.bf16.mxu1 %v5564_v6 }
 0x253   :  { %5000 = vmatpush3.bf16.msra.mxu0 %v6557_v51  ;;  %5020 = vmatpush3.bf16.msra.mxu1 %v6562_v52 }
 0x254   :  { %5001 = vmatprep.subr.bf16.mxu0 %v5564_v6  ;;  %5021 = vmatprep.subr.bf16.mxu1 %v5564_v6 }
 0x257   :  { %5002 = vmatpush3.bf16.msra.mxu0 %v6571_v53  ;;  %5022 = vmatpush3.bf16.msra.mxu1 %v6576_v56 }
 0x258   :  { %5027 = vmatprep.subr.bf16.mxu0 %v5564_v6  ;;  %5047 = vmatprep.subr.bf16.mxu1 %v5564_v6 }
 0x25a   :  { %v6584_v57 = vpop.f32.mrf.mxu0  ;;  %v6586_v62 = vpop.f32.mrf.mxu1  ;;  %5004 = vmatmul.mubr.bf16.vlgmr.msra.gmra.mxu0 %v5812_v3  ;;  %5024 = vmatmul.mubr.bf16.vlgmr.msra.gmra.mxu1 %v5812_v3 }
 0x25b   :  { %5028 = vmatpush3.bf16.msra.mxu0 %v6325_v0  ;;  %5048 = vmatpush3.bf16.msra.mxu1 %v6330_v1 }
 0x25c   :  { %v4765_v63 = vpop.f32.mrf.mxu0  ;;  %v4785_v10 = vpop.f32.mrf.mxu1  ;;  %5029 = vmatprep.subr.bf16.mxu0 %v5564_v6  ;;  %5049 = vmatprep.subr.bf16.mxu1 %v5564_v6 }
 0x25d   :  { %5043 = vmatprep.mubr.msk.bf16.mxu0 %vm5565_vm0, %v5564_v6  ;;  %5063 = vmatprep.mubr.msk.bf16.mxu1 %vm5565_vm0, %v5564_v6 }
 0x25e   :  { %v6598_v12 = vpop.f32.mrf.mxu0  ;;  %v6600_v19 = vpop.f32.mrf.mxu1 }
 0x25f   :  { %v1889_v3 = vpack.c.bf16 %v6598_v12, %v6584_v57  ;;  %v1890_v0 = vpack.c.bf16 %v6600_v19, %v6586_v62  ;;  %5030 = vmatpush3.bf16.msra.mxu0 %v6345_v8  ;;  %5050 = vmatpush3.bf16.msra.mxu1 %v6350_v9 }
 0x260   :  { %v4766_v1 = vpop.f32.mrf.mxu0  ;;  %v4786_v20 = vpop.f32.mrf.mxu1  ;;  %5031 = vmatprep.subr.bf16.mxu0 %v5564_v6  ;;  %5051 = vmatprep.subr.bf16.mxu1 %v5564_v6 }
 0x263   :  { %5032 = vmatpush3.bf16.msra.mxu0 %v6371_v17  ;;  %5052 = vmatpush3.bf16.msra.mxu1 %v6376_v18 }
 0x264   :  { %5033 = vmatprep.subr.bf16.mxu0 %v5564_v6  ;;  %5053 = vmatprep.subr.bf16.mxu1 %v5564_v6 }
 0x267   :  { %5034 = vmatpush3.bf16.msra.mxu0 %v6385_v21  ;;  %5054 = vmatpush3.bf16.msra.mxu1 %v6390_v22 }
 0x268   :  { %5035 = vmatprep.subr.bf16.mxu0 %v5564_v6  ;;  %5055 = vmatprep.subr.bf16.mxu1 %v5564_v6 }
 0x26b   :  { %5036 = vmatpush3.bf16.msra.mxu0 %v6399_v37  ;;  %5056 = vmatpush3.bf16.msra.mxu1 %v6404_v4 }
 0x26c   :  { %5037 = vmatprep.subr.bf16.mxu0 %v5564_v6  ;;  %5057 = vmatprep.subr.bf16.mxu1 %v5564_v6 }
 0x26f   :  { %5038 = vmatpush3.bf16.msra.mxu0 %v6413_v5  ;;  %5058 = vmatpush3.bf16.msra.mxu1 %v6418_v23 }
 0x270   :  { %5039 = vmatprep.subr.bf16.mxu0 %v5564_v6  ;;  %5059 = vmatprep.subr.bf16.mxu1 %v5564_v6 }
 0x273   :  { %5040 = vmatpush3.bf16.msra.mxu0 %v6427_v24  ;;  %5060 = vmatpush3.bf16.msra.mxu1 %v6432_v25 }
 0x274   :  { %5041 = vmatprep.subr.bf16.mxu0 %v5564_v6  ;;  %5061 = vmatprep.subr.bf16.mxu1 %v5564_v6 }
 0x277   :  { %5042 = vmatpush3.bf16.msra.mxu0 %v6441_v26  ;;  %5062 = vmatpush3.bf16.msra.mxu1 %v6446_v27 }
 0x278   :  { %5067 = vmatprep.subr.bf16.mxu0 %v5564_v6  ;;  %5087 = vmatprep.subr.bf16.mxu1 %v5564_v6 }
 0x27a   :  { %v852_v8 = vpop.f32.mrf.mxu0  ;;  %v941_v9 = vpop.f32.mrf.mxu1  ;;  %5044 = vmatmul.mubr.bf16.vlgmr.msra.gmra.mxu0 %v5828_v11  ;;  %5064 = vmatmul.mubr.bf16.vlgmr.msra.gmra.mxu1 %v5828_v11 }
 0x27b   :  { %5068 = vmatpush3.bf16.msra.mxu0 %v6455_v28  ;;  %5088 = vmatpush3.bf16.msra.mxu1 %v6460_v29 }
 0x27c   :  { %v4805_v17 = vpop.f32.mrf.mxu0  ;;  %v4825_v18 = vpop.f32.mrf.mxu1  ;;  %5069 = vmatprep.subr.bf16.mxu0 %v5564_v6  ;;  %5089 = vmatprep.subr.bf16.mxu1 %v5564_v6 }
 0x27d   :  { %5083 = vmatprep.mubr.msk.bf16.mxu0 %vm5565_vm0, %v5564_v6  ;;  %5103 = vmatprep.mubr.msk.bf16.mxu1 %vm5565_vm0, %v5564_v6 }
 0x27e   :  { %v855_v21 = vpop.f32.mrf.mxu0  ;;  %v944_v22 = vpop.f32.mrf.mxu1 }
 0x27f   :  { %5070 = vmatpush3.bf16.msra.mxu0 %v6475_v32  ;;  %5090 = vmatpush3.bf16.msra.mxu1 %v6480_v33  ;;  %v1891_v5 = vpack.c.bf16 %v855_v21, %v852_v8  ;;  %v1892_v23 = vpack.c.bf16 %v944_v22, %v941_v9 }
 0x280   :  { %v4806_v37 = vpop.f32.mrf.mxu0  ;;  %v4826_v4 = vpop.f32.mrf.mxu1  ;;  %5071 = vmatprep.subr.bf16.mxu0 %v5564_v6  ;;  %5091 = vmatprep.subr.bf16.mxu1 %v5564_v6 }
 0x281   :  { %v1904_v24 = vsel %vm1899_vm1, %v1891_v5, 0  ;;  %v1951_v25 = vsel %vm1899_vm1, %v1892_v23, 0 }
 0x283   :  { %5072 = vmatpush3.bf16.msra.mxu0 %v6501_v41  ;;  %5092 = vmatpush3.bf16.msra.mxu1 %v6506_v42 }
 0x284   :  { %5073 = vmatprep.subr.bf16.mxu0 %v5564_v6  ;;  %5093 = vmatprep.subr.bf16.mxu1 %v5564_v6 }
 0x287   :  { %5074 = vmatpush3.bf16.msra.mxu0 %v6515_v45  ;;  %5094 = vmatpush3.bf16.msra.mxu1 %v6520_v46 }
 0x288   :  { %5075 = vmatprep.subr.bf16.mxu0 %v5564_v6  ;;  %5095 = vmatprep.subr.bf16.mxu1 %v5564_v6 }
 0x28b   :  { %5076 = vmatpush3.bf16.msra.mxu0 %v6529_v47  ;;  %5096 = vmatpush3.bf16.msra.mxu1 %v6534_v48 }
 0x28c   :  { %5077 = vmatprep.subr.bf16.mxu0 %v5564_v6  ;;  %5097 = vmatprep.subr.bf16.mxu1 %v5564_v6 }
 0x28f   :  { %5078 = vmatpush3.bf16.msra.mxu0 %v6543_v49  ;;  %5098 = vmatpush3.bf16.msra.mxu1 %v6548_v50 }
 0x290   :  { %5079 = vmatprep.subr.bf16.mxu0 %v5564_v6  ;;  %5099 = vmatprep.subr.bf16.mxu1 %v5564_v6 }
 0x293   :  { %5080 = vmatpush3.bf16.msra.mxu0 %v6557_v51  ;;  %5100 = vmatpush3.bf16.msra.mxu1 %v6562_v52 }
 0x294   :  { %5081 = vmatprep.subr.bf16.mxu0 %v5564_v6  ;;  %5101 = vmatprep.subr.bf16.mxu1 %v5564_v6 }
 0x297   :  { %5082 = vmatpush3.bf16.msra.mxu0 %v6571_v53  ;;  %5102 = vmatpush3.bf16.msra.mxu1 %v6576_v56 }
 0x298   :  { %5107 = vmatprep.subr.bf16.mxu0 %v5564_v6  ;;  %5113 = vmatprep.subr.bf16.mxu1 %v5564_v6 }
 0x29a   :  { %v1030_v26 = vpop.f32.mrf.mxu0  ;;  %v1119_v27 = vpop.f32.mrf.mxu1  ;;  %5084 = vmatmul.mubr.bf16.vlgmr.msra.gmra.mxu0 %v5828_v11  ;;  %5104 = vmatmul.mubr.bf16.vlgmr.msra.gmra.mxu1 %v5828_v11 }
 0x29b   :  { %5108 = vmatpush3.bf16.xpose.msra.mxu0 %v1904_v24  ;;  %5114 = vmatpush3.bf16.xpose.msra.mxu1 %v1951_v25 }
 0x29c   :  { %v4845_v28 = vpop.f32.mrf.mxu0  ;;  %v4865_v29 = vpop.f32.mrf.mxu1  ;;  %5109 = vmatprep.mubr.msk.bf16.mxu0 %vm5565_vm0, %v5564_v6  ;;  %5115 = vmatprep.mubr.msk.bf16.mxu1 %vm5565_vm0, %v5564_v6 }
 0x29d   :  { %5119 = vmatprep.subr.bf16.mxu0 %v5564_v6  ;;  %5125 = vmatprep.subr.bf16.mxu1 %v5564_v6  ;;  %v1874_v29 = vlaneseq }
 0x29e   :  { %v1033_v32 = vpop.f32.mrf.mxu0  ;;  %v1122_v33 = vpop.f32.mrf.mxu1 }
 0x29f   :  { %v1893_v34 = vpack.c.bf16 %v1033_v32, %v1030_v26  ;;  %v1894_v35 = vpack.c.bf16 %v1122_v33, %v1119_v27 }
 0x2a0   :  { %v4846_v41 = vpop.f32.mrf.mxu0  ;;  %v4866_v11 = vpop.f32.mrf.mxu1 }
 0x2a1   :  { %v1998_v42 = vsel %vm1899_vm1, %v1893_v34, 0  ;;  %v2045_v43 = vsel %vm1899_vm1, %v1894_v35, 0  ;;  %v6772_v34 = vshrl.u32 %v1874_v29, 7  ;;  %v1878_v35 = vand.u32 127, %v1874_v29 }
 0x2a2   :  { %5110 = vmatmul.mubr.msk.bf16.vlgmr.msra.gmra.mxu0 %vm1899_vm1, %v1883_v60  ;;  %5116 = vmatmul.mubr.msk.bf16.vlgmr.msra.gmra.mxu1 %vm1899_vm1, %v1884_v61 }
 0x2a3   :  { %5120 = vmatpush3.bf16.xpose.msra.mxu0 %v1998_v42  ;;  %5126 = vmatpush3.bf16.xpose.msra.mxu1 %v2045_v43  ;;  %vm1879_vm2 = vcmp.le.s32.totalorder %v1878_v35, %v6772_v34 }
 0x2a4   :  { %5121 = vmatprep.mubr.msk.bf16.mxu0 %vm5565_vm0, %v5564_v6  ;;  %5127 = vmatprep.mubr.msk.bf16.mxu1 %vm5565_vm0, %v5564_v6 }
 0x2a5   :  { %5131 = vmatprep.subr.bf16.mxu0 %v5564_v6  ;;  %5137 = vmatprep.subr.bf16.mxu1 %v5564_v6 }
 0x2aa   :  { %5122 = vmatmul.mubr.msk.bf16.vlgmr.msra.gmra.mxu0 %vm1899_vm1, %v1885_v15  ;;  %5128 = vmatmul.mubr.msk.bf16.vlgmr.msra.gmra.mxu1 %vm1899_vm1, %v1886_v16 }
 0x2ab   :  { %5133 = vmatprep.mubr.msk.bf16.mxu0 %vm5565_vm0, %v5564_v6  ;;  %5139 = vmatprep.mubr.msk.bf16.mxu1 %vm5565_vm0, %v5564_v6 }
 0x2ba   :  { %v1160_v54 = vpop.f32.mrf.mxu0  ;;  %v1201_v55 = vpop.f32.mrf.mxu1 }
 0x2bc   :  { %v4885_v58 = vpop.f32.mrf.mxu0  ;;  %v4905_v59 = vpop.f32.mrf.mxu1 }
 0x2bd   :  { %v1876_v58 = vadd.s32 8, %v6772_v34 }
 0x2be   :  { %v1163_v60 = vpop.f32.mrf.mxu0  ;;  %v1204_v61 = vpop.f32.mrf.mxu1 }
 0x2bf   :  { %v1895_v2 = vpack.c.bf16 %v1163_v60, %v1160_v54  ;;  %v1896_v13 = vpack.c.bf16 %v1204_v61, %v1201_v55  ;;  %vm1880_vm3 = vcmp.le.s32.totalorder %v1878_v35, %v1876_v58 }
 0x2c0   :  { %v4886_v15 = vpop.f32.mrf.mxu0  ;;  %v4906_v44 = vpop.f32.mrf.mxu1 }
 0x2c1   :  { %v2092_v7 = vsel %vm1899_vm1, %v1895_v2, 0  ;;  %v2139_v14 = vsel %vm1899_vm1, %v1896_v13, 0  ;;  %v5566_v13 = vmov -1e+30  }
 0x2c2   :  { %5132 = vmatpush3.bf16.xpose.msra.mxu0 %v2092_v7  ;;  %5138 = vmatpush3.bf16.xpose.msra.mxu1 %v2139_v14  ;;  %v6784_v15 = vsel %vm1879_vm2, 0.0, %v5566_v13 }
 0x2c3   :  { %5143 = vmatprep.subr.bf16.mxu0 %v5564_v6  ;;  %5149 = vmatprep.subr.bf16.mxu1 %v5564_v6 }
 0x2c9   :  { %5134 = vmatmul.mubr.msk.bf16.vlgmr.msra.gmra.mxu0 %vm1899_vm1, %v1887_v39  ;;  %5140 = vmatmul.mubr.msk.bf16.vlgmr.msra.gmra.mxu1 %vm1899_vm1, %v1888_v40 }
 0x2ca   :  { %5145 = vmatprep.mubr.msk.bf16.mxu0 %vm5565_vm0, %v5564_v6  ;;  %5151 = vmatprep.mubr.msk.bf16.mxu1 %vm5565_vm0, %v5564_v6 }
 0x2da   :  { %v1242_v16 = vpop.f32.mrf.mxu0  ;;  %v1283_v45 = vpop.f32.mrf.mxu1 }
 0x2dc   :  { %v4925_v46 = vpop.f32.mrf.mxu0  ;;  %v4945_v47 = vpop.f32.mrf.mxu1 }
 0x2de   :  { %v1245_v48 = vpop.f32.mrf.mxu0  ;;  %v1286_v49 = vpop.f32.mrf.mxu1 }
 0x2df   :  { %v1897_v30 = vpack.c.bf16 %v1245_v48, %v1242_v16  ;;  %v1898_v36 = vpack.c.bf16 %v1286_v49, %v1283_v45  ;;  %v6789_v48 = vsel %vm1880_vm3, 0.0, %v5566_v13 }
 0x2e0   :  { %v4926_v39 = vpop.f32.mrf.mxu0  ;;  %v4946_v50 = vpop.f32.mrf.mxu1 }
 0x2e1   :  { %v2186_v31 = vsel %vm1899_vm1, %v1897_v30, 0  ;;  %v2233_v38 = vsel %vm1899_vm1, %v1898_v36, 0 }
 0x2e2   :  { %5144 = vmatpush3.bf16.xpose.msra.mxu0 %v2186_v31  ;;  %5150 = vmatpush3.bf16.xpose.msra.mxu1 %v2233_v38 }
 0x2e3   :  { %5155 = vmatprep.subr.bf16.mxu0 %v5564_v6  ;;  %5161 = vmatprep.subr.bf16.mxu1 %v5564_v6 }
 0x2e9   :  { %5146 = vmatmul.mubr.msk.bf16.vlgmr.msra.gmra.mxu0 %vm1899_vm1, %v1889_v3  ;;  %5152 = vmatmul.mubr.msk.bf16.vlgmr.msra.gmra.mxu1 %vm1899_vm1, %v1890_v0 }
 0x2ea   :  { %5157 = vmatprep.mubr.msk.bf16.mxu0 %vm5565_vm0, %v5564_v6  ;;  %5163 = vmatprep.mubr.msk.bf16.mxu1 %vm5565_vm0, %v5564_v6 }
 0x2fa   :  { %v1436_v40 = vpop.f32.mrf.mxu0  ;;  %v1525_v51 = vpop.f32.mrf.mxu1 }
 0x2fc   :  { %v4965_v52 = vpop.f32.mrf.mxu0  ;;  %v4985_v53 = vpop.f32.mrf.mxu1 }
 0x2fe   :  { %v1439_v56 = vpop.f32.mrf.mxu0  ;;  %v1528_v63 = vpop.f32.mrf.mxu1 }
 0x2ff   :  { %v2493_v57 = vpack.c.bf16 %v1439_v56, %v1436_v40  ;;  %v2494_v10 = vpack.c.bf16 %v1528_v63, %v1525_v51 }
 0x300   :  { %v4966_v12 = vpop.f32.mrf.mxu0  ;;  %v4986_v3 = vpop.f32.mrf.mxu1 }
 0x301   :  { %5156 = vmatpush3.bf16.msra.mxu0 %v2493_v57  ;;  %5162 = vmatpush3.bf16.msra.mxu1 %v2494_v10 }
 0x302   :  { %5167 = vmatprep.subr.bf16.mxu0 %v5564_v6  ;;  %5173 = vmatprep.subr.bf16.mxu1 %v5564_v6 }
 0x31a   :  { %v6744_v62 = vpop.f32.mrf.mxu0  ;;  %v6746_v19 = vpop.f32.mrf.mxu1 }
 0x31c   :  { %v5005_v0 = vpop.f32.mrf.mxu0  ;;  %v5025_v1 = vpop.f32.mrf.mxu1 }
 0x31e   :  { %v6748_v20 = vpop.f32.mrf.mxu0  ;;  %v6750_v8 = vpop.f32.mrf.mxu1 }
 0x31f   :  { %v2495_v9 = vpack.c.bf16 %v6748_v20, %v6744_v62  ;;  %v2496_v17 = vpack.c.bf16 %v6750_v8, %v6746_v19 }
 0x320   :  { %v5006_v18 = vpop.f32.mrf.mxu0  ;;  %v5026_v21 = vpop.f32.mrf.mxu1 }
 0x33a   :  { %v6756_v22 = vpop.f32.mrf.mxu0  ;;  %v6758_v37 = vpop.f32.mrf.mxu1 }
 0x33c   :  { %v5045_v4 = vpop.f32.mrf.mxu0  ;;  %v5065_v5 = vpop.f32.mrf.mxu1 }
 0x33e   :  { %v6760_v23 = vpop.f32.mrf.mxu0  ;;  %v6762_v24 = vpop.f32.mrf.mxu1 }
 0x33f   :  { %v2497_v25 = vpack.c.bf16 %v6760_v23, %v6756_v22  ;;  %v2498_v26 = vpack.c.bf16 %v6762_v24, %v6758_v37 }
 0x340   :  { %v5046_v27 = vpop.f32.mrf.mxu0  ;;  %v5066_v28 = vpop.f32.mrf.mxu1 }
 0x35a   :  { %v6768_v32 = vpop.f32.mrf.mxu0  ;;  %v6770_v33 = vpop.f32.mrf.mxu1 }
 0x35c   :  { %v5085_v41 = vpop.f32.mrf.mxu0  ;;  %v5105_v11 = vpop.f32.mrf.mxu1 }
 0x35e   :  { %v6774_v42 = vpop.f32.mrf.mxu0  ;;  %v6776_v43 = vpop.f32.mrf.mxu1 }
 0x35f   :  { %v2499_v54 = vpack.c.bf16 %v6774_v42, %v6768_v32  ;;  %v2500_v55 = vpack.c.bf16 %v6776_v43, %v6770_v33 }
 0x360   :  { %v5086_v59 = vpop.f32.mrf.mxu0  ;;  %v5106_v60 = vpop.f32.mrf.mxu1 }
 0x362   :  { %v1940_v61 = vpop.f32.mrf.mxu0  ;;  %v1987_v2 = vpop.f32.mrf.mxu1 }
 0x363   :  { %v2276_v44 = vmul.f32 0.17677669, %v1940_v61  ;;  %v2278_v7 = vmul.f32 0.17677669, %v1987_v2 }
 0x364   :  { %v5111_v14 = vpop.f32.mrf.mxu0  ;;  %v5117_v16 = vpop.f32.mrf.mxu1 }
 0x365   :  { %v6787_v45 = vadd.f32 %v2276_v44, %v6784_v15  ;;  %v6794_v39 = vadd.f32 %v2278_v7, %v6784_v15 }
 0x366   :  { %v1943_v46 = vpop.f32.mrf.mxu0  ;;  %v1990_v47 = vpop.f32.mrf.mxu1 }
 0x367   :  { %v2277_v49 = vmul.f32 0.17677669, %v1943_v46  ;;  %v2279_v30 = vmul.f32 0.17677669, %v1990_v47  ;;  %v2309_v36 = vsel %vm2308_vm4, %v6787_v45, -inf  ;;  %v2315_v63 = vsel %vm2308_vm4, %v6794_v39, -inf }
 0x368   :  { %v5118_v50 = vpop.f32.mrf.mxu1  ;;  %2310 = vmax.xlane.f32.xlu0 %v2309_v36  ;;  %v5112_v31 = vpop.f32.mrf.mxu0 }
 0x369   :  { %v6797_v38 = vadd.f32 %v2277_v49, %v6789_v48  ;;  %v6800_v52 = vadd.f32 %v2279_v30, %v6789_v48 }
 0x36a   :  { %v2034_v40 = vpop.f32.mrf.mxu0  ;;  %v2081_v51 = vpop.f32.mrf.mxu1 }
 0x36b   :  { %v2280_v53 = vmul.f32 0.17677669, %v2034_v40  ;;  %v2282_v56 = vmul.f32 0.17677669, %v2081_v51  ;;  %v2312_v57 = vsel %vm2308_vm4, %v6797_v38, -inf  ;;  %v2318_v18 = vsel %vm2308_vm4, %v6800_v52, -inf }
 0x36c   :  { %v5129_v10 = vpop.f32.mrf.mxu1  ;;  %2316 = vmax.xlane.f32.xlu0 %v2315_v63  ;;  %2313 = vmax.xlane.f32.xlu1 %v2312_v57  ;;  %v5123_v12 = vpop.f32.mrf.mxu0 }
 0x36d   :  { %v6807_v3 = vadd.f32 %v2280_v53, %v6784_v15  ;;  %v6814_v27 = vadd.f32 %v2282_v56, %v6784_v15 }
 0x36e   :  { %v2037_v0 = vpop.f32.mrf.mxu0  ;;  %v2084_v1 = vpop.f32.mrf.mxu1 }
 0x36f   :  { %v2281_v21 = vmul.f32 0.17677669, %v2037_v0  ;;  %v2283_v4 = vmul.f32 0.17677669, %v2084_v1  ;;  %v2321_v5 = vsel %vm2308_vm4, %v6807_v3, -inf  ;;  %v2327_v41 = vsel %vm2308_vm4, %v6814_v27, -inf }
 0x370   :  { %v5130_v28 = vpop.f32.mrf.mxu1  ;;  %2319 = vmax.xlane.f32.xlu1 %v2318_v18  ;;  %2322 = vmax.xlane.f32.xlu0 %v2321_v5  ;;  %v5124_v29 = vpop.f32.mrf.mxu0 }
 0x371   :  { %v6817_v35 = vadd.f32 %v2281_v21, %v6789_v48  ;;  %v6824_v58 = vadd.f32 %v2283_v4, %v6789_v48 }
 0x373   :  { %v2324_v11 = vsel %vm2308_vm4, %v6817_v35, -inf  ;;  %v2330_v59 = vsel %vm2308_vm4, %v6824_v58, -inf }
 0x374   :  { %2328 = vmax.xlane.f32.xlu0 %v2327_v41  ;;  %2325 = vmax.xlane.f32.xlu1 %v2324_v11 }
 0x378   :  { %2331 = vmax.xlane.f32.xlu1 %v2330_v59 }
 0x389   :  { %v2128_v60 = vpop.f32.mrf.mxu0  ;;  %v2175_v61 = vpop.f32.mrf.mxu1 }
 0x38a   :  { %v2284_v2 = vmul.f32 0.17677669, %v2128_v60  ;;  %v2286_v13 = vmul.f32 0.17677669, %v2175_v61 }
 0x38b   :  { %v5135_v44 = vpop.f32.mrf.mxu0  ;;  %v5141_v7 = vpop.f32.mrf.mxu1 }
 0x38c   :  { %v6829_v14 = vadd.f32 %v2284_v2, %v6784_v15  ;;  %v6834_v36 = vadd.f32 %v2286_v13, %v6784_v15 }
 0x38d   :  { %v2131_v16 = vpop.f32.mrf.mxu0  ;;  %v2178_v46 = vpop.f32.mrf.mxu1 }
 0x38e   :  { %v2285_v47 = vmul.f32 0.17677669, %v2131_v16  ;;  %v2287_v49 = vmul.f32 0.17677669, %v2178_v46  ;;  %v2333_v30 = vsel %vm2308_vm4, %v6829_v14, -inf  ;;  %v2339_v51 = vsel %vm2308_vm4, %v6834_v36, -inf }
 0x38f   :  { %v5142_v50 = vpop.f32.mrf.mxu1  ;;  %2334 = vmax.xlane.f32.xlu0 %v2333_v30  ;;  %v5136_v31 = vpop.f32.mrf.mxu0 }
 0x390   :  { %v6837_v40 = vadd.f32 %v2285_v47, %v6789_v48  ;;  %v6844_v56 = vadd.f32 %v2287_v49, %v6789_v48 }
 0x392   :  { %v2336_v53 = vsel %vm2308_vm4, %v6837_v40, -inf  ;;  %v2342_v63 = vsel %vm2308_vm4, %v6844_v56, -inf }
 0x393   :  { %2340 = vmax.xlane.f32.xlu0 %v2339_v51  ;;  %2337 = vmax.xlane.f32.xlu1 %v2336_v53 }
 0x397   :  { %2343 = vmax.xlane.f32.xlu1 %v2342_v63 }
 0x3a9   :  { %v2222_v57 = vpop.f32.mrf.mxu0  ;;  %v2269_v10 = vpop.f32.mrf.mxu1 }
 0x3aa   :  { %v2288_v12 = vmul.f32 0.17677669, %v2222_v57  ;;  %v2290_v0 = vmul.f32 0.17677669, %v2269_v10 }
 0x3ab   :  { %v5147_v1 = vpop.f32.mrf.mxu0  ;;  %v5153_v18 = vpop.f32.mrf.mxu1 }
 0x3ac   :  { %v6849_v21 = vadd.f32 %v2288_v12, %v6784_v15  ;;  %v6854_v11 = vadd.f32 %v2290_v0, %v6784_v15 }
 0x3ad   :  { %v2225_v4 = vpop.f32.mrf.mxu0  ;;  %v2272_v5 = vpop.f32.mrf.mxu1 }
 0x3ae   :  { %v2289_v28 = vmul.f32 0.17677669, %v2225_v4  ;;  %v2291_v29 = vmul.f32 0.17677669, %v2272_v5  ;;  %v2345_v41 = vsel %vm2308_vm4, %v6849_v21, -inf  ;;  %v2351_v2 = vsel %vm2308_vm4, %v6854_v11, -inf }
 0x3af   :  { %v5154_v59 = vpop.f32.mrf.mxu1  ;;  %2346 = vmax.xlane.f32.xlu0 %v2345_v41  ;;  %v5148_v60 = vpop.f32.mrf.mxu0 }
 0x3b0   :  { %v6857_v61 = vadd.f32 %v2289_v28, %v6789_v48  ;;  %v6864_v44 = vadd.f32 %v2291_v29, %v6789_v48 }
 0x3b2   :  { %v2348_v13 = vsel %vm2308_vm4, %v6857_v61, -inf  ;;  %v2354_v15 = vsel %vm2308_vm4, %v6864_v44, -inf }
 0x3b3   :  { %2352 = vmax.xlane.f32.xlu0 %v2351_v2  ;;  %2349 = vmax.xlane.f32.xlu1 %v2348_v13 }
 0x3b7   :  { %2355 = vmax.xlane.f32.xlu1 %v2354_v15 }
 0x3f1   :  { %v2311_v7 = vpop.xlane.xlu0 %2310 }
 0x3f2   :  { %v2357_v16 = vsub.f32 %v6787_v45, %v2311_v7 }
 0x3f4   :  { %v2373_v46 = vmul.f32 1.442695, %v2357_v16 }
 0x3f5   :  { %v2317_v47 = vpop.xlane.xlu0 %2316  ;;  %v2314_v49 = vpop.xlane.xlu1 %2313 }
 0x3f6   :  { %5466 = vpow2.f32 %v2373_v46  ;;  %v2359_v30 = vsub.f32 %v6794_v39, %v2317_v47  ;;  %v2358_v50 = vsub.f32 %v6797_v38, %v2314_v49 }
 0x3f8   :  { %v2377_v31 = vmul.f32 1.442695, %v2359_v30  ;;  %v2375_v48 = vmul.f32 1.442695, %v2358_v50 }
 0x3f9   :  { %v2320_v51 = vpop.xlane.xlu1 %2319  ;;  %v2323_v53 = vpop.xlane.xlu0 %2322 }
 0x3fa   :  { %5468 = vpow2.f32 %v2377_v31  ;;  %v2360_v63 = vsub.f32 %v6800_v52, %v2320_v51  ;;  %v2361_v57 = vsub.f32 %v6807_v3, %v2323_v53 }
 0x3fb   :  { %5470 = vpow2.f32 %v2375_v48 }
 0x3fc   :  { %v2379_v10 = vmul.f32 1.442695, %v2360_v63  ;;  %v2381_v45 = vmul.f32 1.442695, %v2361_v57 }
 0x3fd   :  { %v2329_v12 = vpop.xlane.xlu0 %2328  ;;  %v2326_v0 = vpop.xlane.xlu1 %2325 }
 0x3fe   :  { %5472 = vpow2.f32 %v2379_v10  ;;  %v2363_v1 = vsub.f32 %v6814_v27, %v2329_v12  ;;  %v2362_v39 = vsub.f32 %v6817_v35, %v2326_v0 }
 0x3ff   :  { %5474 = vpow2.f32 %v2381_v45 }
 0x400   :  { %v2385_v38 = vmul.f32 1.442695, %v2363_v1  ;;  %v2383_v18 = vmul.f32 1.442695, %v2362_v39 }
 0x401   :  { %v2332_v4 = vpop.xlane.xlu1 %2331 }
 0x402   :  { %5476 = vpow2.f32 %v2385_v38  ;;  %v2364_v5 = vsub.f32 %v6824_v58, %v2332_v4 }
 0x403   :  { %v6876_v52 = vpop.eup %5466  ;;  %5478 = vpow2.f32 %v2383_v18 }
 0x404   :  { %v2387_v3 = vmul.f32 1.442695, %v2364_v5  ;;  %v2405_v28 = vsel %vm2308_vm4, %v6876_v52, 0.0 }
 0x405   :  { %2406 = vadd.xlane.f32.xlu0 %v2405_v28 }
 0x406   :  { %5480 = vpow2.f32 %v2387_v3 }
 0x407   :  { %v6880_v29 = vpop.eup %5468 }
 0x408   :  { %v6882_v27 = vpop.eup %5470  ;;  %v2411_v35 = vsel %vm2308_vm4, %v6880_v29, 0.0 }
 0x409   :  { %2412 = vadd.xlane.f32.xlu0 %v2411_v35  ;;  %v2408_v58 = vsel %vm2308_vm4, %v6882_v27, 0.0 }
 0x40a   :  { %2409 = vadd.xlane.f32.xlu1 %v2408_v58 }
 0x40b   :  { %v6888_v41 = vpop.eup %5472 }
 0x40c   :  { %v6890_v59 = vpop.eup %5474  ;;  %v2414_v60 = vsel %vm2308_vm4, %v6888_v41, 0.0 }
 0x40d   :  { %v2417_v2 = vsel %vm2308_vm4, %v6890_v59, 0.0 }
 0x40e   :  { %2418 = vadd.xlane.f32.xlu0 %v2417_v2  ;;  %2415 = vadd.xlane.f32.xlu1 %v2414_v60 }
 0x40f   :  { %v6896_v13 = vpop.eup %5476 }
 0x410   :  { %v6898_v15 = vpop.eup %5478  ;;  %v2423_v7 = vsel %vm2308_vm4, %v6896_v13, 0.0 }
 0x411   :  { %v2420_v16 = vsel %vm2308_vm4, %v6898_v15, 0.0 }
 0x412   :  { %2424 = vadd.xlane.f32.xlu0 %v2423_v7  ;;  %2421 = vadd.xlane.f32.xlu1 %v2420_v16 }
 0x413   :  { %v6904_v46 = vpop.eup %5480 }
 0x414   :  { %v2426_v47 = vsel %vm2308_vm4, %v6904_v46, 0.0 }
 0x416   :  { %2427 = vadd.xlane.f32.xlu1 %v2426_v47 }
 0x418   :  { %v2335_v49 = vpop.xlane.xlu0 %2334 }
 0x419   :  { %v2365_v30 = vsub.f32 %v6829_v14, %v2335_v49 }
 0x41b   :  { %v2389_v50 = vmul.f32 1.442695, %v2365_v30 }
 0x41c   :  { %v2341_v31 = vpop.xlane.xlu0 %2340  ;;  %v2338_v48 = vpop.xlane.xlu1 %2337 }
 0x41d   :  { %5482 = vpow2.f32 %v2389_v50  ;;  %v2367_v51 = vsub.f32 %v6834_v36, %v2341_v31  ;;  %v2366_v53 = vsub.f32 %v6837_v40, %v2338_v48 }
 0x41f   :  { %v2393_v63 = vmul.f32 1.442695, %v2367_v51  ;;  %v2391_v57 = vmul.f32 1.442695, %v2366_v53 }
 0x420   :  { %v2344_v10 = vpop.xlane.xlu1 %2343 }
 0x421   :  { %5484 = vpow2.f32 %v2393_v63  ;;  %v2368_v45 = vsub.f32 %v6844_v56, %v2344_v10 }
 0x422   :  { %5486 = vpow2.f32 %v2391_v57 }
 0x423   :  { %v2395_v12 = vmul.f32 1.442695, %v2368_v45 }
 0x425   :  { %5488 = vpow2.f32 %v2395_v12 }
 0x42a   :  { %v6912_v0 = vpop.eup %5482 }
 0x42b   :  { %v2429_v14 = vsel %vm2308_vm4, %v6912_v0, 0.0 }
 0x42c   :  { %2430 = vadd.xlane.f32.xlu0 %v2429_v14 }
 0x42e   :  { %v6916_v1 = vpop.eup %5484 }
 0x42f   :  { %v6918_v36 = vpop.eup %5486  ;;  %v2435_v40 = vsel %vm2308_vm4, %v6916_v1, 0.0 }
 0x430   :  { %2436 = vadd.xlane.f32.xlu0 %v2435_v40  ;;  %v2432_v56 = vsel %vm2308_vm4, %v6918_v36, 0.0 }
 0x431   :  { %2433 = vadd.xlane.f32.xlu1 %v2432_v56 }
 0x432   :  { %v6924_v39 = vpop.eup %5488 }
 0x433   :  { %v2438_v38 = vsel %vm2308_vm4, %v6924_v39, 0.0 }
 0x435   :  { %2439 = vadd.xlane.f32.xlu1 %v2438_v38 }
 0x438   :  { %v2347_v18 = vpop.xlane.xlu0 %2346 }
 0x439   :  { %v2369_v4 = vsub.f32 %v6849_v21, %v2347_v18 }
 0x43b   :  { %v2397_v5 = vmul.f32 1.442695, %v2369_v4 }
 0x43c   :  { %v2353_v3 = vpop.xlane.xlu0 %2352  ;;  %v2350_v28 = vpop.xlane.xlu1 %2349 }
 0x43d   :  { %5490 = vpow2.f32 %v2397_v5  ;;  %v2371_v35 = vsub.f32 %v6854_v11, %v2353_v3  ;;  %v2370_v58 = vsub.f32 %v6857_v61, %v2350_v28 }
 0x43f   :  { %v2401_v60 = vmul.f32 1.442695, %v2371_v35  ;;  %v2399_v2 = vmul.f32 1.442695, %v2370_v58 }
 0x440   :  { %v2356_v7 = vpop.xlane.xlu1 %2355 }
 0x441   :  { %5492 = vpow2.f32 %v2401_v60  ;;  %v2372_v16 = vsub.f32 %v6864_v44, %v2356_v7 }
 0x442   :  { %5494 = vpow2.f32 %v2399_v2 }
 0x443   :  { %v2403_v47 = vmul.f32 1.442695, %v2372_v16 }
 0x445   :  { %5496 = vpow2.f32 %v2403_v47 }
 0x44a   :  { %v6932_v49 = vpop.eup %5490 }
 0x44b   :  { %v2441_v21 = vsel %vm2308_vm4, %v6932_v49, 0.0 }
 0x44c   :  { %2442 = vadd.xlane.f32.xlu0 %v2441_v21 }
 0x44e   :  { %v6936_v30 = vpop.eup %5492 }
 0x44f   :  { %v6938_v11 = vpop.eup %5494  ;;  %v2447_v61 = vsel %vm2308_vm4, %v6936_v30, 0.0 }
 0x450   :  { %2448 = vadd.xlane.f32.xlu0 %v2447_v61  ;;  %v2444_v44 = vsel %vm2308_vm4, %v6938_v11, 0.0 }
 0x451   :  { %2445 = vadd.xlane.f32.xlu1 %v2444_v44 }
 0x452   :  { %v6944_v50 = vpop.eup %5496 }
 0x453   :  { %v2450_v31 = vsel %vm2308_vm4, %v6944_v50, 0.0 }
 0x455   :  { %2451 = vadd.xlane.f32.xlu1 %v2450_v31 }
 0x48e   :  { %v2407_v48 = vpop.xlane.xlu0 %2406 }
 0x48f   :  { %5498 = vrcp.f32 %v2407_v48 }
 0x492   :  { %v2413_v51 = vpop.xlane.xlu0 %2412 }
 0x493   :  { %v2410_v53 = vpop.xlane.xlu1 %2409 }
 0x494   :  { %5500 = vrcp.f32 %v2410_v53 }
 0x495   :  { %5502 = vrcp.f32 %v2413_v51  ;;  %v5374_v51 = vld [vmem:[%s7346_s6 + $0x28] sm:$0xff]  }
 0x497   :  { %v2419_v63 = vpop.xlane.xlu0 %2418  ;;  %v2416_v57 = vpop.xlane.xlu1 %2415 }
 0x498   :  { %5504 = vrcp.f32 %v2416_v57 }
 0x499   :  { %5506 = vrcp.f32 %v2419_v63 }
 0x49b   :  { %v2425_v10 = vpop.xlane.xlu0 %2424  ;;  %v2422_v45 = vpop.xlane.xlu1 %2421 }
 0x49c   :  { %5508 = vrcp.f32 %v2422_v45  ;;  %v5499_v12 = vpop.eup %5498  ;;  %v5375_v45 = vld [vmem:[%s7346_s6 + $0x20] sm:$0xff]  }
 0x49d   :  { %5510 = vrcp.f32 %v2425_v10  ;;  %v2469_v56 = vmul.f32 %v5499_v12, %v6876_v52 }
 0x49f   :  { %v2428_v14 = vpop.xlane.xlu1 %2427 }
 0x4a0   :  { %5512 = vrcp.f32 %v2428_v14 }
 0x4a1   :  { %v5501_v40 = vpop.eup %5500 }
 0x4a2   :  { %v2470_v38 = vmul.f32 %v5501_v40, %v6882_v27  ;;  %v5503_v18 = vpop.eup %5502  ;;  %v5376_v40 = vld [vmem:[%s7346_s6 + $0x38] sm:$0xff]  }
 0x4a3   :  { %v2471_v3 = vmul.f32 %v5503_v18, %v6880_v29 }
 0x4a4   :  { %v2485_v4 = vpack.c.bf16 %v2470_v38, %v2469_v56 }
 0x4a5   :  { %v5505_v5 = vpop.eup %5504 }
 0x4a6   :  { %5158 = vmatmul.mubr.msk.bf16.vlgmr.msra.gmra.mxu0 %vm2308_vm4, %v2485_v4  ;;  %v2472_v28 = vmul.f32 %v5505_v5, %v6888_v41  ;;  %v5507_v35 = vpop.eup %5506 }
 0x4a7   :  { %5168 = vmatpush3.bf16.msra.mxu0 %v2495_v9  ;;  %5169 = vmatprep.mubr.msk.bf16.mxu0 %vm5565_vm0, %v5564_v6  ;;  %v2473_v60 = vmul.f32 %v5507_v35, %v6890_v59 }
 0x4a8   :  { %5179 = vmatprep.subr.bf16.mxu0 %v5564_v6  ;;  %v2486_v52 = vpack.c.bf16 %v2472_v28, %v2471_v3  ;;  %v5377_v3 = vld [vmem:[%s7346_s6 + $0x30] sm:$0xff]  }
 0x4a9   :  { %v5509_v27 = vpop.eup %5508 }
 0x4aa   :  { %v5511_v58 = vpop.eup %5510  ;;  %5164 = vmatmul.mubr.msk.bf16.vlgmr.msra.gmra.mxu1 %vm2308_vm4, %v2486_v52  ;;  %v2474_v62 = vmul.f32 %v5509_v27, %v6898_v15 }
 0x4ab   :  { %5174 = vmatpush3.bf16.msra.mxu1 %v2496_v17  ;;  %5175 = vmatprep.mubr.msk.bf16.mxu1 %vm5565_vm0, %v5564_v6  ;;  %v2475_v29 = vmul.f32 %v5511_v58, %v6896_v13 }
 0x4ac   :  { %v2487_v9 = vpack.c.bf16 %v2474_v62, %v2473_v60  ;;  %5185 = vmatprep.subr.bf16.mxu1 %v5564_v6 }
 0x4ad   :  { %v5513_v20 = vpop.eup %5512 }
 0x4ae   :  { %v2476_v41 = vmul.f32 %v5513_v20, %v6904_v46  ;;  %5170 = vmatmul.mubr.msk.bf16.vlgmr.msra.gmra.mxu0 %vm2308_vm4, %v2487_v9 }
 0x4af   :  { %5180 = vmatpush3.bf16.msra.mxu0 %v2497_v25  ;;  %5181 = vmatprep.mubr.msk.bf16.mxu0 %vm5565_vm0, %v5564_v6 }
 0x4b0   :  { %v2488_v59 = vpack.c.bf16 %v2476_v41, %v2475_v29  ;;  %5191 = vmatprep.subr.bf16.mxu0 %v5564_v6 }
 0x4b2   :  { %5176 = vmatmul.mubr.msk.bf16.vlgmr.msra.gmra.mxu1 %vm2308_vm4, %v2488_v59 }
 0x4b3   :  { %5186 = vmatpush3.bf16.msra.mxu1 %v2498_v26  ;;  %5187 = vmatprep.mubr.msk.bf16.mxu1 %vm5565_vm0, %v5564_v6 }
 0x4b4   :  { %5197 = vmatprep.subr.bf16.mxu1 %v5564_v6 }
 0x4b5   :  { %v2431_v19 = vpop.xlane.xlu0 %2430 }
 0x4b6   :  { %5514 = vrcp.f32 %v2431_v19 }
 0x4b9   :  { %v2437_v8 = vpop.xlane.xlu0 %2436 }
 0x4ba   :  { %v2434_v17 = vpop.xlane.xlu1 %2433 }
 0x4bb   :  { %5516 = vrcp.f32 %v2434_v17 }
 0x4bc   :  { %5518 = vrcp.f32 %v2437_v8 }
 0x4be   :  { %v2440_v22 = vpop.xlane.xlu1 %2439 }
 0x4bf   :  { %5520 = vrcp.f32 %v2440_v22 }
 0x4c3   :  { %v5515_v23 = vpop.eup %5514 }
 0x4c4   :  { %v2477_v13 = vmul.f32 %v5515_v23, %v6912_v0 }
 0x4c8   :  { %v5517_v25 = vpop.eup %5516 }
 0x4c9   :  { %v2478_v37 = vmul.f32 %v5517_v25, %v6918_v36  ;;  %v5519_v24 = vpop.eup %5518 }
 0x4ca   :  { %v2479_v46 = vmul.f32 %v5519_v24, %v6916_v1 }
 0x4cb   :  { %v2489_v26 = vpack.c.bf16 %v2478_v37, %v2477_v13 }
 0x4cc   :  { %v5521_v15 = vpop.eup %5520 }
 0x4cd   :  { %5182 = vmatmul.mubr.msk.bf16.vlgmr.msra.gmra.mxu0 %vm2308_vm4, %v2489_v26  ;;  %v2480_v2 = vmul.f32 %v5521_v15, %v6924_v39 }
 0x4ce   :  { %5192 = vmatpush3.bf16.msra.mxu0 %v2499_v54  ;;  %5193 = vmatprep.mubr.msk.bf16.mxu0 %vm5565_vm0, %v5564_v6 }
 0x4cf   :  { %v2490_v7 = vpack.c.bf16 %v2480_v2, %v2479_v46  ;;  %5203 = vmatprep.subr.bf16.mxu0 %v5564_v6 }
 0x4d1   :  { %5188 = vmatmul.mubr.msk.bf16.vlgmr.msra.gmra.mxu1 %vm2308_vm4, %v2490_v7 }
 0x4d2   :  { %5198 = vmatpush3.bf16.msra.mxu1 %v2500_v55  ;;  %5199 = vmatprep.mubr.msk.bf16.mxu1 %vm5565_vm0, %v5564_v6  ;;  %v5370_v55 = vld [vmem:[%s7346_s6 + $0x8] sm:$0xff]  }
 0x4d3   :  { %5211 = vmatprep.subr.bf16.mxu1 %v5564_v6 }
 0x4d5   :  { %v2443_v0 = vpop.xlane.xlu0 %2442 }
 0x4d6   :  { %5522 = vrcp.f32 %v2443_v0 }
 0x4d9   :  { %v2449_v32 = vpop.xlane.xlu0 %2448 }
 0x4da   :  { %v2446_v42 = vpop.xlane.xlu1 %2445 }
 0x4db   :  { %5524 = vrcp.f32 %v2446_v42 }
 0x4dc   :  { %5526 = vrcp.f32 %v2449_v32 }
 0x4de   :  { %v2452_v54 = vpop.xlane.xlu1 %2451 }
 0x4df   :  { %5528 = vrcp.f32 %v2452_v54 }
 0x4e3   :  { %v5523_v1 = vpop.eup %5522 }
 0x4e4   :  { %v2481_v39 = vmul.f32 %v5523_v1, %v6932_v49  ;;  %v5371_v49 = vld [vmem:[%s7346_s6] sm:$0xff]  }
 0x4e8   :  { %v5525_v36 = vpop.eup %5524 }
 0x4e9   :  { %v2482_v33 = vmul.f32 %v5525_v36, %v6938_v11  ;;  %v5527_v43 = vpop.eup %5526  ;;  %v5372_v11 = vld [vmem:[%s7346_s6 + $0x18] sm:$0xff]  }
 0x4ea   :  { %v2483_v21 = vmul.f32 %v5527_v43, %v6936_v30  ;;  %v5373_v30 = vld [vmem:[%s7346_s6 + $0x10] sm:$0xff]  }
 0x4eb   :  { %v2491_v16 = vpack.c.bf16 %v2482_v33, %v2481_v39 }
 0x4ec   :  { %v5529_v47 = vpop.eup %5528 }
 0x4ed   :  { %5194 = vmatmul.mubr.msk.bf16.vlgmr.msra.gmra.mxu0 %vm2308_vm4, %v2491_v16  ;;  %v2484_v61 = vmul.f32 %v5529_v47, %v6944_v50 }
 0x4ee   :  { %5204 = vmatpush3.bf16.msra.mxu0 %v5370_v55  ;;  %5207 = vmatprep.mubr.msk.bf16.mxu0 %vm5565_vm0, %v5564_v6 }
 0x4ef   :  { %v2492_v44 = vpack.c.bf16 %v2484_v61, %v2483_v21  ;;  %5205 = vmatprep.subr.bf16.mxu0 %v5564_v6  ;;  %v4231_v61 = vld [vmem:[%s7347_s7] ss:$0 sm:$0xff] }
 0x4f1   :  { %5200 = vmatmul.mubr.msk.bf16.vlgmr.msra.gmra.mxu1 %vm2308_vm4, %v2492_v44 }
 0x4f2   :  { %5206 = vmatpush3.bf16.msra.mxu0 %v5371_v49  ;;  %5212 = vmatpush3.bf16.msra.mxu1 %v5372_v11 }
 0x4f3   :  { %5213 = vmatprep.subr.bf16.mxu1 %v5564_v6  ;;  %5219 = vmatprep.subr.bf16.mxu0 %v5564_v6 }
 0x4f4   :  { %5215 = vmatprep.mubr.msk.bf16.mxu1 %vm5565_vm0, %v5564_v6 }
 0x4f6   :  { %5214 = vmatpush3.bf16.msra.mxu1 %v5373_v30 }
 0x4f7   :  { %5227 = vmatprep.subr.bf16.mxu1 %v5564_v6 }
 0x566   :  { %v2538_v50 = vpop.f32.mrf.mxu0 }
 0x568   :  { %v5159_v31 = vpop.f32.mrf.mxu0 }
 0x56a   :  { %v2541_v48 = vpop.f32.mrf.mxu0  ;;  %v2582_v63 = vpop.f32.mrf.mxu1 }
 0x56b   :  { %v2853_v53 = vpack.c.bf16 %v2541_v48, %v2538_v50 }
 0x56c   :  { %v5160_v57 = vpop.f32.mrf.mxu0  ;;  %v5165_v10 = vpop.f32.mrf.mxu1 }
 0x56d   :  { %5208 = vmatmul.mubr.msk.bf16.vlgmr.msra.gmra.mxu0 %vm1899_vm1, %v2853_v53  ;;  %v5538_v53 = vld [vmem:[%s7340_s0] sm:$0xff] }
 0x56e   :  { %5220 = vmatpush3.bf16.msra.mxu0 %v5374_v51  ;;  %5223 = vmatprep.mubr.msk.bf16.mxu0 %vm5565_vm0, %v5564_v6  ;;  %v2585_v12 = vpop.f32.mrf.mxu1  ;;  %v2626_v14 = vpop.f32.mrf.mxu0 }
 0x56f   :  { %5221 = vmatprep.subr.bf16.mxu0 %v5564_v6  ;;  %v2854_v56 = vpack.c.bf16 %v2585_v12, %v2582_v63 }
 0x570   :  { %v5166_v38 = vpop.f32.mrf.mxu1  ;;  %v5171_v18 = vpop.f32.mrf.mxu0 }
 0x571   :  { %5216 = vmatmul.mubr.msk.bf16.vlgmr.msra.gmra.mxu1 %vm1899_vm1, %v2854_v56 }
 0x572   :  { %5222 = vmatpush3.bf16.msra.mxu0 %v5375_v45  ;;  %v2629_v4 = vpop.f32.mrf.mxu0  ;;  %v2670_v5 = vpop.f32.mrf.mxu1  ;;  %5228 = vmatpush3.bf16.msra.mxu1 %v5376_v40 }
 0x573   :  { %5231 = vmatprep.mubr.msk.bf16.mxu1 %vm5565_vm0, %v5564_v6  ;;  %v2855_v28 = vpack.c.bf16 %v2629_v4, %v2626_v14  ;;  %5229 = vmatprep.subr.bf16.mxu1 %v5564_v6 }
 0x574   :  { %5235 = vmatprep.subr.bf16.mxu0 %v5564_v6  ;;  %v5172_v35 = vpop.f32.mrf.mxu0  ;;  %v5177_v52 = vpop.f32.mrf.mxu1 }
 0x575   :  { %5224 = vmatmul.mubr.msk.bf16.vlgmr.msra.gmra.mxu0 %vm1899_vm1, %v2855_v28 }
 0x576   :  { %v2673_v27 = vpop.f32.mrf.mxu1  ;;  %5230 = vmatpush3.bf16.msra.mxu1 %v5377_v3  ;;  %5236 = vmatpush3.bf16.msra.mxu0 %v5370_v55 }
 0x577   :  { %v2856_v58 = vpack.c.bf16 %v2673_v27, %v2670_v5  ;;  %5237 = vmatprep.subr.bf16.mxu0 %v5564_v6  ;;  %5243 = vmatprep.subr.bf16.mxu1 %v5564_v6 }
 0x578   :  { %v5178_v60 = vpop.f32.mrf.mxu1  ;;  %5239 = vmatprep.mubr.msk.bf16.mxu0 %vm5565_vm0, %v5564_v6 }
 0x579   :  { %5232 = vmatmul.mubr.msk.bf16.vlgmr.msra.gmra.mxu1 %vm1899_vm1, %v2856_v58 }
 0x57a   :  { %5238 = vmatpush3.bf16.msra.mxu0 %v5371_v49  ;;  %5244 = vmatpush3.bf16.msra.mxu1 %v5372_v11 }
 0x57b   :  { %5245 = vmatprep.subr.bf16.mxu1 %v5564_v6  ;;  %5247 = vmatprep.mubr.msk.bf16.mxu1 %vm5565_vm0, %v5564_v6 }
 0x57c   :  { %5251 = vmatprep.subr.bf16.mxu0 %v5564_v6 }
 0x57e   :  { %5246 = vmatpush3.bf16.msra.mxu1 %v5373_v30 }
 0x57f   :  { %5259 = vmatprep.subr.bf16.mxu1 %v5564_v6 }
 0x58d   :  { %v2714_v62 = vpop.f32.mrf.mxu0 }
 0x58f   :  { %v5183_v20 = vpop.f32.mrf.mxu0 }
 0x591   :  { %v2717_v9 = vpop.f32.mrf.mxu0  ;;  %v2758_v29 = vpop.f32.mrf.mxu1 }
 0x592   :  { %v2857_v41 = vpack.c.bf16 %v2717_v9, %v2714_v62 }
 0x593   :  { %v5184_v59 = vpop.f32.mrf.mxu0  ;;  %v5189_v19 = vpop.f32.mrf.mxu1 }
 0x594   :  { %5240 = vmatmul.mubr.msk.bf16.vlgmr.msra.gmra.mxu0 %vm1899_vm1, %v2857_v41 }
 0x595   :  { %v2761_v8 = vpop.f32.mrf.mxu1  ;;  %5252 = vmatpush3.bf16.msra.mxu0 %v5374_v51  ;;  %5255 = vmatprep.mubr.msk.bf16.mxu0 %vm5565_vm0, %v5564_v6 }
 0x596   :  { %v2858_v17 = vpack.c.bf16 %v2761_v8, %v2758_v29  ;;  %5253 = vmatprep.subr.bf16.mxu0 %v5564_v6 }
 0x597   :  { %v5190_v22 = vpop.f32.mrf.mxu1 }
 0x598   :  { %5248 = vmatmul.mubr.msk.bf16.vlgmr.msra.gmra.mxu1 %vm1899_vm1, %v2858_v17  ;;  %v5540_v17 = vld [vmem:[%s7340_s0 + $0x10] sm:$0xff] }
 0x599   :  { %5254 = vmatpush3.bf16.msra.mxu0 %v5375_v45  ;;  %5260 = vmatpush3.bf16.msra.mxu1 %v5376_v40  ;;  %v5539_v45 = vld [vmem:[%s7340_s0 + $0x8] sm:$0xff] }
 0x59a   :  { %5261 = vmatprep.subr.bf16.mxu1 %v5564_v6  ;;  %5263 = vmatprep.mubr.msk.bf16.mxu1 %vm5565_vm0, %v5564_v6 }
 0x59d   :  { %5262 = vmatpush3.bf16.msra.mxu1 %v5377_v3 }
 0x5ad   :  { %v2802_v23 = vpop.f32.mrf.mxu0 }
 0x5af   :  { %v5195_v25 = vpop.f32.mrf.mxu0 }
 0x5b1   :  { %v2805_v13 = vpop.f32.mrf.mxu0  ;;  %v2846_v37 = vpop.f32.mrf.mxu1 }
 0x5b2   :  { %v2859_v24 = vpack.c.bf16 %v2805_v13, %v2802_v23  ;;  %v5541_v13 = vld [vmem:[%s7340_s0 + $0x18] sm:$0xff] }
 0x5b3   :  { %v5196_v26 = vpop.f32.mrf.mxu0  ;;  %v5201_v15 = vpop.f32.mrf.mxu1 }
 0x5b4   :  { %5256 = vmatmul.mubr.msk.bf16.vlgmr.msra.gmra.mxu0 %vm1899_vm1, %v2859_v24  ;;  %v5378_v24 = vld [vmem:[%s7350_s10 + $0xe0] ss:$16 sps:$4 sm:$0xff]   ;;  %v5380_v26 = vld [vmem:[%s7350_s10 + $0xe4] ss:$16 sps:$4 sm:$0xff]   ;;  %v5381_v15 = vld [vmem:[%s7350_s10 + $0xe8] ss:$16 sps:$4 sm:$0xff]  }
 0x5b5   :  { %v2849_v46 = vpop.f32.mrf.mxu1  ;;  %3586 = vmatprep.subr.bf16.mxu0 %v5380_v26 }
 0x5b6   :  { %v2860_v2 = vpack.c.bf16 %v2849_v46, %v2846_v37  ;;  %v5383_v46 = vld [vmem:[%s7350_s10 + $0xec] ss:$16 sps:$4 sm:$0xff]   ;;  %3587 = vmatpush1.bf16.msra.mxu0 %v5378_v24  ;;  %v4232_v24 = vld [vmem:[%s7348_s8] ss:$0 sm:$0xff] }
 0x5b7   :  { %v5202_v7 = vpop.f32.mrf.mxu1  ;;  %3639 = vmatprep.subr.bf16.mxu1 %v5383_v46 }
 0x5b8   :  { %5264 = vmatmul.mubr.msk.bf16.vlgmr.msra.gmra.mxu1 %vm1899_vm1, %v2860_v2 }
 0x5b9   :  { %3640 = vmatpush1.bf16.msra.mxu1 %v5381_v15 }
 0x62d   :  { %v2926_v0 = vpop.f32.mrf.mxu0 }
 0x62f   :  { %v5209_v32 = vpop.f32.mrf.mxu0 }
 0x631   :  { %v2929_v42 = vpop.f32.mrf.mxu0  ;;  %v2982_v54 = vpop.f32.mrf.mxu1 }
 0x632   :  { %v3277_v33 = vadd.f32 %v2982_v54, %v2926_v0 }
 0x633   :  { %v5210_v6 = vpop.f32.mrf.mxu0  ;;  %v5217_v1 = vpop.f32.mrf.mxu1 }
 0x635   :  { %v2985_v36 = vpop.f32.mrf.mxu1  ;;  %v3038_v39 = vpop.f32.mrf.mxu0 }
 0x636   :  { %v3278_v16 = vadd.f32 %v3277_v33, %v3038_v39  ;;  %v3280_v49 = vadd.f32 %v2985_v36, %v2929_v42  ;;  %v5386_v36 = vld [vmem:[%s7350_s10 + $0xc4] ss:$16 sps:$4 sm:$0xff]   ;;  %v5389_v39 = vld [vmem:[%s7350_s10 + $0xcc] ss:$16 sps:$4 sm:$0xff]   ;;  %v5384_v33 = vld [vmem:[%s7350_s10 + $0xc0] ss:$16 sps:$4 sm:$0xff]  }
 0x637   :  { %v5218_v43 = vpop.f32.mrf.mxu1  ;;  %v5225_v55 = vpop.f32.mrf.mxu0  ;;  %3588 = vmatprep.subr.bf16.mxu0 %v5386_v36  ;;  %3641 = vmatprep.subr.bf16.mxu1 %v5389_v39  ;;  %v5431_v36 = vld [vmem:[%s7352_s12 + $0xf0] sm:$0xff]  }
 0x638   :  { %v5387_v43 = vld [vmem:[%s7350_s10 + $0xc8] ss:$16 sps:$4 sm:$0xff]   ;;  %3589 = vmatpush1.bf16.msra.mxu0 %v5384_v33  ;;  %v5392_v55 = vld [vmem:[%s7350_s10 + $0xa4] ss:$16 sps:$4 sm:$0xff]  }
 0x639   :  { %v3041_v47 = vpop.f32.mrf.mxu0  ;;  %v3094_v21 = vpop.f32.mrf.mxu1  ;;  %3642 = vmatpush1.bf16.msra.mxu1 %v5387_v43  ;;  %3590 = vmatprep.subr.bf16.mxu0 %v5392_v55  ;;  %v5432_v39 = vld [vmem:[%s7352_s12 + $0x30] sm:$0xff]   ;;  %v5434_v43 = vld [vmem:[%s7352_s12 + $0x68] sm:$0xff]  }
 0x63a   :  { %v3279_v11 = vadd.f32 %v3278_v16, %v3094_v21  ;;  %v3281_v50 = vadd.f32 %v3280_v49, %v3041_v47  ;;  %v5395_v16 = vld [vmem:[%s7350_s10 + $0xac] ss:$16 sps:$4 sm:$0xff]   ;;  %v5390_v47 = vld [vmem:[%s7350_s10 + $0xa0] ss:$16 sps:$4 sm:$0xff]   ;;  %v5393_v21 = vld [vmem:[%s7350_s10 + $0xa8] ss:$16 sps:$4 sm:$0xff]  }
 0x63b   :  { %v5226_v44 = vpop.f32.mrf.mxu0  ;;  %v5233_v30 = vpop.f32.mrf.mxu1  ;;  %3643 = vmatprep.subr.bf16.mxu1 %v5395_v16  ;;  %v5398_v49 = vld [vmem:[%s7350_s10 + $0x84] ss:$16 sps:$4 sm:$0xff]   ;;  %v5435_v55 = vld [vmem:[%s7352_s12 + $0xe8] sm:$0xff]  }
 0x63c   :  { %v3296_v31 = vadd.f32 %v4231_v61, %v3279_v11  ;;  %3591 = vmatpush1.bf16.msra.mxu0 %v5390_v47  ;;  %v5399_v11 = vld [vmem:[%s7350_s10 + $0x88] ss:$16 sps:$4 sm:$0xff]   ;;  %v5401_v44 = vld [vmem:[%s7350_s10 + $0x8c] ss:$16 sps:$4 sm:$0xff]   ;;  %v5404_v30 = vld [vmem:[%s7350_s10 + $0x64] ss:$16 sps:$4 sm:$0xff]  }
 0x63d   :  { %v3097_v48 = vpop.f32.mrf.mxu1  ;;  %3644 = vmatpush1.bf16.msra.mxu1 %v5393_v21  ;;  %3592 = vmatprep.subr.bf16.mxu0 %v5398_v49  ;;  %v5433_v33 = vld [vmem:[%s7352_s12 + $0xb0] sm:$0xff]   ;;  %v5436_v16 = vld [vmem:[%s7352_s12 + $0x28] sm:$0xff]   ;;  %v5438_v21 = vld [vmem:[%s7352_s12 + $0x60] sm:$0xff]  }
 0x63e   :  { %v3282_v51 = vadd.f32 %v3281_v50, %v3097_v48  ;;  %v7076_v63 = vadd.f32 %v5538_v53, %v3296_v31  ;;  %v5407_v50 = vld [vmem:[%s7350_s10 + $0x6c] ss:$16 sps:$4 sm:$0xff]   ;;  %3645 = vmatprep.subr.bf16.mxu1 %v5401_v44  ;;  %v5402_v31 = vld [vmem:[%s7350_s10 + $0x60] ss:$16 sps:$4 sm:$0xff]   ;;  %v5405_v48 = vld [vmem:[%s7350_s10 + $0x68] ss:$16 sps:$4 sm:$0xff]  }
 0x63f   :  { %v5234_v57 = vpop.f32.mrf.mxu1  ;;  %v5413_v53 = vld [vmem:[%s7350_s10 + $0x4c] ss:$16 sps:$4 sm:$0xff]   ;;  %v5440_v49 = vld [vmem:[%s7352_s12 + $0x20] sm:$0xff]  }
 0x640   :  { %v3297_v10 = vadd.f32 %v4231_v61, %v3282_v51  ;;  %3306 = vadd.xlane.f32.xlu0 %v7076_v63  ;;  %v5410_v51 = vld [vmem:[%s7350_s10 + $0x44] ss:$16 sps:$4 sm:$0xff]   ;;  %v5567_v57 = vmov 0   ;;  %v5437_v47 = vld [vmem:[%s7352_s12 + $0xa8] sm:$0xff]   ;;  %v5442_v44 = vld [vmem:[%s7352_s12 + $0x58] sm:$0xff]  }
 0x641   :  { %3646 = vmatpush1.bf16.msra.mxu1 %v5399_v11  ;;  %3618 = vmatprep.mubr.bf16.mxu0 %v5567_v57  ;;  %v5441_v11 = vld [vmem:[%s7352_s12 + $0xa0] sm:$0xff]  }
 0x642   :  { %v7082_v12 = vadd.f32 %v5539_v45, %v3297_v10  ;;  %3647 = vmatprep.subr.bf16.mxu1 %v5407_v50  ;;  %3671 = vmatprep.mubr.bf16.mxu1 %v5567_v57  ;;  %v5408_v10 = vld [vmem:[%s7350_s10 + $0x40] ss:$16 sps:$4 sm:$0xff]   ;;  %v5411_v45 = vld [vmem:[%s7350_s10 + $0x48] ss:$16 sps:$4 sm:$0xff]  }
 0x643   :  { %v5444_v50 = vld [vmem:[%s7352_s12 + $0x18] sm:$0xff]  }
 0x644   :  { %3308 = vadd.xlane.f32.xlu1 %v7082_v12 }
 0x645   :  { %3648 = vmatpush1.bf16.msra.mxu1 %v5405_v48 }
 0x646   :  { %3649 = vmatprep.subr.bf16.mxu1 %v5413_v53 }
 0x649   :  { %3650 = vmatpush1.bf16.msra.mxu1 %v5411_v45 }
 0x654   :  { %v3138_v14 = vpop.f32.mrf.mxu0 }
 0x656   :  { %v5241_v40 = vpop.f32.mrf.mxu0 }
 0x657   :  { %v5419_v40 = vld [vmem:[%s7350_s10 + $0x2c] ss:$16 sps:$4 sm:$0xff]  }
 0x658   :  { %v3141_v56 = vpop.f32.mrf.mxu0  ;;  %v3182_v38 = vpop.f32.mrf.mxu1  ;;  %3651 = vmatprep.subr.bf16.mxu1 %v5419_v40 }
 0x659   :  { %v3283_v35 = vadd.f32 %v3182_v38, %v3138_v14  ;;  %v5416_v14 = vld [vmem:[%s7350_s10 + $0x24] ss:$16 sps:$4 sm:$0xff]   ;;  %v5417_v38 = vld [vmem:[%s7350_s10 + $0x28] ss:$16 sps:$4 sm:$0xff]  }
 0x65a   :  { %v5242_v18 = vpop.f32.mrf.mxu0  ;;  %v5249_v4 = vpop.f32.mrf.mxu1  ;;  %3652 = vmatpush1.bf16.msra.mxu1 %v5417_v38 }
 0x65b   :  { %v5422_v18 = vld [vmem:[%s7350_s10 + $0x4] ss:$16 sps:$4 sm:$0xff]   ;;  %v5425_v4 = vld [vmem:[%s7350_s10 + $0xc] ss:$16 sps:$4 sm:$0xff]  }
 0x65c   :  { %v3185_v5 = vpop.f32.mrf.mxu1  ;;  %3653 = vmatprep.subr.bf16.mxu1 %v5425_v4 }
 0x65d   :  { %v3286_v62 = vadd.f32 %v3185_v5, %v3141_v56  ;;  %v5414_v56 = vld [vmem:[%s7350_s10 + $0x20] ss:$16 sps:$4 sm:$0xff]  }
 0x65e   :  { %v5250_v3 = vpop.f32.mrf.mxu1  ;;  %v5420_v5 = vld [vmem:[%s7350_s10] ss:$16 sps:$4 sm:$0xff]  }
 0x65f   :  { %v5423_v3 = vld [vmem:[%s7350_s10 + $0x8] ss:$16 sps:$4 sm:$0xff]  }
 0x660   :  { %3654 = vmatpush1.bf16.msra.mxu1 %v5423_v3 }
 0x674   :  { %v3226_v28 = vpop.f32.mrf.mxu0 }
 0x675   :  { %v3284_v27 = vadd.f32 %v3283_v35, %v3226_v28 }
 0x676   :  { %v5257_v52 = vpop.f32.mrf.mxu0 }
 0x678   :  { %v3229_v58 = vpop.f32.mrf.mxu0  ;;  %v3270_v60 = vpop.f32.mrf.mxu1 }
 0x679   :  { %v3285_v20 = vadd.f32 %v3284_v27, %v3270_v60  ;;  %v3287_v41 = vadd.f32 %v3286_v62, %v3229_v58 }
 0x67a   :  { %v5258_v9 = vpop.f32.mrf.mxu0  ;;  %v5265_v29 = vpop.f32.mrf.mxu1 }
 0x67b   :  { %v3298_v59 = vadd.f32 %v4231_v61, %v3285_v20  ;;  %v5426_v9 = vld [vmem:[%s7352_s12 + $0x78] sm:$0xff]  }
 0x67c   :  { %v3273_v19 = vpop.f32.mrf.mxu1  ;;  %v5427_v29 = vld [vmem:[%s7352_s12 + $0xf8] sm:$0xff]  }
 0x67d   :  { %v3288_v8 = vadd.f32 %v3287_v41, %v3273_v19  ;;  %v7088_v22 = vadd.f32 %v5540_v17, %v3298_v59  ;;  %4599 = vmatprep.subr.bf16.mxu1 %v5427_v29  ;;  %v5454_v29 = vld [vmem:[%s7352_s12 + $0x40] sm:$0xff]  }
 0x67e   :  { %v5266_v23 = vpop.f32.mrf.mxu1 }
 0x67f   :  { %v3299_v25 = vadd.f32 %v4231_v61, %v3288_v8  ;;  %3310 = vadd.xlane.f32.xlu0 %v7088_v22  ;;  %v5396_v61 = vld [vmem:[%s7350_s10 + $0x80] ss:$16 sps:$4 sm:$0xff]  }
 0x680   :  { %3593 = vmatpush1.bf16.msra.mxu0 %v5396_v61  ;;  %v5439_v61 = vld [vmem:[%s7352_s12 + $0xe0] sm:$0xff]  }
 0x681   :  { %v7094_v37 = vadd.f32 %v5541_v13, %v3299_v25  ;;  %3594 = vmatprep.subr.bf16.mxu0 %v5404_v30  ;;  %v5443_v30 = vld [vmem:[%s7352_s12 + $0xd8] sm:$0xff]  }
 0x683   :  { %3312 = vadd.xlane.f32.xlu1 %v7094_v37 }
 0x684   :  { %3595 = vmatpush1.bf16.msra.mxu0 %v5402_v31  ;;  %v5445_v31 = vld [vmem:[%s7352_s12 + $0x98] sm:$0xff]  }
 0x685   :  { %3596 = vmatprep.subr.bf16.mxu0 %v5410_v51 }
 0x688   :  { %3597 = vmatpush1.bf16.msra.mxu0 %v5408_v10 }
 0x689   :  { %3598 = vmatprep.subr.bf16.mxu0 %v5416_v14 }
 0x68c   :  { %3599 = vmatpush1.bf16.msra.mxu0 %v5414_v56 }
 0x68d   :  { %3600 = vmatprep.subr.bf16.mxu0 %v5422_v18 }
 0x690   :  { %3601 = vmatpush1.bf16.msra.mxu0 %v5420_v5 }
 0x691   :  { %4571 = vmatprep.subr.bf16.mxu0 %v5426_v9  ;;  %v5453_v9 = vld [vmem:[%s7352_s12 + $0x88] sm:$0xff]  }
 0x6c9   :  { %v3307_v2 = vpop.xlane.xlu0 %3306 }
 0x6ca   :  { %v3314_v7 = vmul.f32 0.0078125, %v3307_v2  ;;  %v4233_v2 = vld [vmem:[%s7349_s9] ss:$0 sm:$0xff] }
 0x6cc   :  { %v7110_v0 = vsub.f32 %v7076_v63, %v3314_v7 }
 0x6cd   :  { %v3309_v32 = vpop.xlane.xlu1 %3308 }
 0x6ce   :  { %v3315_v42 = vmul.f32 0.0078125, %v3309_v32  ;;  %v3322_v54 = vmul.f32 %v7110_v0, %v7110_v0 }
 0x6d0   :  { %v7115_v6 = vsub.f32 %v7082_v12, %v3315_v42  ;;  %3326 = vadd.xlane.f32.xlu0 %v3322_v54 }
 0x6d2   :  { %v3323_v1 = vmul.f32 %v7115_v6, %v7115_v6 }
 0x6d4   :  { %3328 = vadd.xlane.f32.xlu1 %v3323_v1  ;;  %v5429_v1 = vld [vmem:[%s7352_s12 + $0xb8] sm:$0xff]  }
 0x708   :  { %v3311_v28 = vpop.xlane.xlu0 %3310 }
 0x709   :  { %v3316_v35 = vmul.f32 0.0078125, %v3311_v28 }
 0x70b   :  { %v7206_v52 = vsub.f32 %v7088_v22, %v3316_v35  ;;  %v5446_v35 = vld [vmem:[%s7352_s12 + $0x50] sm:$0xff]  }
 0x70c   :  { %v3313_v27 = vpop.xlane.xlu1 %3312 }
 0x70d   :  { %v3317_v58 = vmul.f32 0.0078125, %v3313_v27  ;;  %v3324_v60 = vmul.f32 %v7206_v52, %v7206_v52  ;;  %v5447_v27 = vld [vmem:[%s7352_s12 + $0xd0] sm:$0xff]  }
 0x70f   :  { %v7211_v62 = vsub.f32 %v7094_v37, %v3317_v58  ;;  %3330 = vadd.xlane.f32.xlu0 %v3324_v60  ;;  %v5449_v58 = vld [vmem:[%s7352_s12 + $0x90] sm:$0xff]   ;;  %v5450_v60 = vld [vmem:[%s7352_s12 + $0x48] sm:$0xff]  }
 0x711   :  { %v3325_v20 = vmul.f32 %v7211_v62, %v7211_v62 }
 0x713   :  { %3332 = vadd.xlane.f32.xlu1 %v3325_v20  ;;  %v5452_v20 = vld [vmem:[%s7352_s12 + $0x8] sm:$0xff]  }
 0x759   :  { %v3327_v41 = vpop.xlane.xlu0 %3326 }
 0x75a   :  { %v3334_v59 = vmul.f32 0.0078125, %v3327_v41  ;;  %v5455_v41 = vld [vmem:[%s7352_s12 + $0xc0] sm:$0xff]  }
 0x75c   :  { %v3338_v19 = vadd.f32 1e-05, %v3334_v59  ;;  %v5456_v59 = vld [vmem:[%s7352_s12] sm:$0xff]  }
 0x75d   :  { %v3329_v8 = vpop.xlane.xlu1 %3328 }
 0x75e   :  { %5530 = vrsqrt.f32 %v3338_v19  ;;  %v3335_v17 = vmul.f32 0.0078125, %v3329_v8  ;;  %v5457_v19 = vld [vmem:[%s7352_s12 + $0x80] sm:$0xff]   ;;  %v3412_v8 = vsub.s32 1, %v6772_v34 }
 0x760   :  { %v3339_v23 = vadd.f32 1e-05, %v3335_v17  ;;  %v3420_v17 = vsub.s32 3, %v6772_v34 }
 0x762   :  { %5532 = vrsqrt.f32 %v3339_v23  ;;  %v3408_v23 = vsub.s32 0, %v6772_v34 }
 0x76b   :  { %v5531_v25 = vpop.eup %5530 }
 0x76c   :  { %v3346_v13 = vmul.f32 %v5531_v25, %v7110_v0  ;;  %v5428_v0 = vld [vmem:[%s7352_s12 + $0x38] sm:$0xff]   ;;  %v3416_v25 = vsub.s32 2, %v6772_v34 }
 0x76e   :  { %v3356_v46 = vmul.f32 %v4232_v24, %v3346_v13  ;;  %v3404_v13 = vld [vmem:[%s7351_s11] sm:$0xf] }
 0x76f   :  { %v5533_v26 = vpop.eup %5532 }
 0x770   :  { %v3347_v15 = vmul.f32 %v5533_v26, %v7115_v6  ;;  %v3366_v32 = vadd.f32 %v4233_v2, %v3356_v46  ;;  %v5430_v6 = vld [vmem:[%s7352_s12 + $0x70] sm:$0xff]   ;;  %v3421_v46 = vrot.slane %v3404_v13, %v3420_v17 }
 0x772   :  { %v3357_v7 = vmul.f32 %v4232_v24, %v3347_v15  ;;  %v3413_v15 = vrot.slane %v3404_v13, %v3412_v8 }
 0x774   :  { %v3367_v42 = vadd.f32 %v4233_v2, %v3357_v7  ;;  %v3417_v7 = vrot.slane %v3404_v13, %v3416_v25 }
 0x776   :  { %v3370_v54 = vpack.c.bf16 %v3367_v42, %v3366_v32 }
 0x778   :  { %3619 = vmatmul.mubr.bf16.vlgmr.msra.gmra.mxu0 %v3370_v54  ;;  %3672 = vmatmul.mubr.bf16.vlgmr.msra.gmra.mxu1 %v3370_v54 }
 0x779   :  { %3628 = vmatprep.mubr.bf16.mxu0 %v5567_v57  ;;  %3681 = vmatprep.mubr.bf16.mxu1 %v5567_v57 }
 0x77a   :  { %4572 = vmatpush3.bf16.msra.mxu0 %v5428_v0  ;;  %4600 = vmatpush3.bf16.msra.mxu1 %v5429_v1 }
 0x77b   :  { %4573 = vmatprep.subr.bf16.mxu0 %v5430_v6  ;;  %4601 = vmatprep.subr.bf16.mxu1 %v5431_v36 }
 0x77e   :  { %4574 = vmatpush3.bf16.msra.mxu0 %v5432_v39  ;;  %4602 = vmatpush3.bf16.msra.mxu1 %v5433_v33 }
 0x77f   :  { %4575 = vmatprep.subr.bf16.mxu0 %v5434_v43  ;;  %4603 = vmatprep.subr.bf16.mxu1 %v5435_v55 }
 0x782   :  { %4576 = vmatpush3.bf16.msra.mxu0 %v5436_v16  ;;  %4604 = vmatpush3.bf16.msra.mxu1 %v5437_v47 }
 0x783   :  { %4577 = vmatprep.subr.bf16.mxu0 %v5438_v21  ;;  %4605 = vmatprep.subr.bf16.mxu1 %v5439_v61 }
 0x786   :  { %4578 = vmatpush3.bf16.msra.mxu0 %v5440_v49  ;;  %4606 = vmatpush3.bf16.msra.mxu1 %v5441_v11 }
 0x787   :  { %4579 = vmatprep.subr.bf16.mxu0 %v5442_v44  ;;  %4607 = vmatprep.subr.bf16.mxu1 %v5443_v30 }
 0x78a   :  { %4580 = vmatpush3.bf16.msra.mxu0 %v5444_v50  ;;  %4608 = vmatpush3.bf16.msra.mxu1 %v5445_v31 }
 0x78b   :  { %4581 = vmatprep.subr.bf16.mxu0 %v5446_v35  ;;  %4609 = vmatprep.subr.bf16.mxu1 %v5447_v27 }
 0x78e   :  { %4610 = vmatpush3.bf16.msra.mxu1 %v5449_v58 }
 0x798   :  { %v3331_v48 = vpop.xlane.xlu0 %3330 }
 0x799   :  { %v3336_v51 = vmul.f32 0.0078125, %v3331_v48 }
 0x79b   :  { %v3340_v53 = vadd.f32 1e-05, %v3336_v51 }
 0x79c   :  { %v3333_v57 = vpop.xlane.xlu1 %3332 }
 0x79d   :  { %5534 = vrsqrt.f32 %v3340_v53  ;;  %v3337_v10 = vmul.f32 0.0078125, %v3333_v57 }
 0x79f   :  { %v3341_v45 = vadd.f32 1e-05, %v3337_v10 }
 0x7a1   :  { %5536 = vrsqrt.f32 %v3341_v45 }
 0x7aa   :  { %v5535_v14 = vpop.eup %5534 }
 0x7ab   :  { %v3348_v40 = vmul.f32 %v5535_v14, %v7206_v52  ;;  %v5448_v52 = vld [vmem:[%s7352_s12 + $0x10] sm:$0xff]  }
 0x7ac   :  { %4582 = vmatpush3.bf16.msra.mxu0 %v5448_v52 }
 0x7ad   :  { %v3358_v18 = vmul.f32 %v4232_v24, %v3348_v40  ;;  %4583 = vmatprep.subr.bf16.mxu0 %v5450_v60 }
 0x7ae   :  { %v5537_v56 = vpop.eup %5536 }
 0x7af   :  { %v3349_v38 = vmul.f32 %v5537_v56, %v7211_v62  ;;  %v3368_v5 = vadd.f32 %v4233_v2, %v3358_v18  ;;  %v5451_v62 = vld [vmem:[%s7352_s12 + $0xc8] sm:$0xff]  }
 0x7b0   :  { %4611 = vmatprep.subr.bf16.mxu1 %v5451_v62  ;;  %4584 = vmatpush3.bf16.msra.mxu0 %v5452_v20 }
 0x7b1   :  { %v3359_v4 = vmul.f32 %v4232_v24, %v3349_v38  ;;  %4612 = vmatpush3.bf16.msra.mxu1 %v5453_v9  ;;  %4585 = vmatprep.subr.bf16.mxu0 %v5454_v29 }
 0x7b2   :  { %4613 = vmatprep.subr.bf16.mxu1 %v5455_v41 }
 0x7b3   :  { %v3369_v3 = vadd.f32 %v4233_v2, %v3359_v4  ;;  %v3409_v2 = vrot.slane %v3404_v13, %v3408_v23 }
 0x7b4   :  { %4586 = vmatpush3.bf16.msra.mxu0 %v5456_v59 }
 0x7b5   :  { %v3371_v28 = vpack.c.bf16 %v3369_v3, %v3368_v5  ;;  %4614 = vmatpush3.bf16.msra.mxu1 %v5457_v19 }
 0x7b7   :  { %3629 = vmatmul.mubr.bf16.gmra.mxu0 %v3371_v28  ;;  %3682 = vmatmul.mubr.bf16.gmra.mxu1 %v3371_v28 }
 0x838   :  { %v3620_v24 = vpop.f32.mrf.mxu0  ;;  %v3673_v26 = vpop.f32.mrf.mxu1 }
 0x839   :  { %v3621_v33 = vadd.f32 %v3620_v24, %v3409_v2  ;;  %v3674_v34 = vadd.f32 %v3673_v26, %v3417_v7 }
 0x83a   :  { %v3622_v32 = vpop.f32.mrf.mxu0  ;;  %v3675_v42 = vpop.f32.mrf.mxu1 }
 0x83b   :  { %v3623_v1 = vadd.f32 %v3622_v32, %v3413_v15  ;;  %v3676_v6 = vadd.f32 %v3675_v42, %v3421_v46  ;;  %v3692_v50 = vmax.f32 %v3621_v33, 0.0  ;;  %v3694_v31 = vmax.f32 %v3674_v34, 0.0 }
 0x83c   :  { %v3624_v54 = vpop.f32.mrf.mxu0  ;;  %v3677_v0 = vpop.f32.mrf.mxu1 }
 0x83d   :  { %v3625_v36 = vadd.f32 %v3624_v54, %v3409_v2  ;;  %v3678_v39 = vadd.f32 %v3677_v0, %v3417_v7  ;;  %v3693_v49 = vmax.f32 %v3623_v1, 0.0  ;;  %v3695_v11 = vmax.f32 %v3676_v6, 0.0 }
 0x83e   :  { %v3626_v43 = vpop.f32.mrf.mxu0  ;;  %v3679_v55 = vpop.f32.mrf.mxu1 }
 0x83f   :  { %v3627_v16 = vadd.f32 %v3626_v43, %v3413_v15  ;;  %v3680_v47 = vadd.f32 %v3679_v55, %v3421_v46  ;;  %v3696_v21 = vmax.f32 %v3625_v36, 0.0  ;;  %v3698_v61 = vmax.f32 %v3678_v39, 0.0 }
 0x841   :  { %v3697_v44 = vmax.f32 %v3627_v16, 0.0  ;;  %v3699_v30 = vmax.f32 %v3680_v47, 0.0  ;;  %v3708_v53 = vpack.c.bf16 %v3696_v21, %v3692_v50  ;;  %v3710_v57 = vpack.c.bf16 %v3698_v61, %v3694_v31 }
 0x843   :  { %v3709_v48 = vpack.c.bf16 %v3697_v44, %v3693_v49  ;;  %v3711_v51 = vpack.c.bf16 %v3699_v30, %v3695_v11 }
 0x845   :  { %4011 = vmatprep.mubr.bf16.mxu0 %v3709_v48  ;;  %4060 = vmatprep.mubr.bf16.mxu1 %v3711_v51 }
 0x846   :  { %4012 = vmatmul.mubr.bf16.vlgmr.msra.gmra.mxu0 %v3708_v53  ;;  %4061 = vmatmul.mubr.bf16.vlgmr.msra.gmra.mxu1 %v3710_v57 }
 0x877   :  { %v3630_v10 = vpop.f32.mrf.mxu0  ;;  %v3683_v45 = vpop.f32.mrf.mxu1 }
 0x878   :  { %v3631_v28 = vadd.f32 %v3630_v10, %v3409_v2  ;;  %v3684_v35 = vadd.f32 %v3683_v45, %v3417_v7 }
 0x879   :  { %v3632_v14 = vpop.f32.mrf.mxu0  ;;  %v3685_v40 = vpop.f32.mrf.mxu1 }
 0x87a   :  { %v3633_v18 = vadd.f32 %v3632_v14, %v3413_v15  ;;  %v3686_v4 = vadd.f32 %v3685_v40, %v3421_v46  ;;  %v3700_v19 = vmax.f32 %v3631_v28, 0.0  ;;  %v3702_v8 = vmax.f32 %v3684_v35, 0.0 }
 0x87b   :  { %v3634_v56 = vpop.f32.mrf.mxu0  ;;  %v3687_v38 = vpop.f32.mrf.mxu1 }
 0x87c   :  { %v3635_v5 = vadd.f32 %v3634_v56, %v3409_v2  ;;  %v3688_v3 = vadd.f32 %v3687_v38, %v3417_v7  ;;  %v3701_v9 = vmax.f32 %v3633_v18, 0.0  ;;  %v3703_v29 = vmax.f32 %v3686_v4, 0.0 }
 0x87d   :  { %v3636_v27 = vpop.f32.mrf.mxu0  ;;  %v3689_v52 = vpop.f32.mrf.mxu1 }
 0x87e   :  { %v3637_v58 = vadd.f32 %v3636_v27, %v3413_v15  ;;  %v3690_v60 = vadd.f32 %v3689_v52, %v3421_v46  ;;  %v3704_v62 = vmax.f32 %v3635_v5, 0.0  ;;  %v3706_v20 = vmax.f32 %v3688_v3, 0.0  ;;  %v4266_v15 = vld [vmem:[%s7353_s13] ss:$0 sm:$0xff]  ;;  %s5568_s13 = smov [#allocation2]  }
 0x87f   :  { %s4090_s9 = sshll.u32 %s5568_s13, 4  ;;  %s4091_s9 = int_to_ptr.vmem [resolvable:$true] %s4090_s9 }
 0x880   :  { %v3705_v41 = vmax.f32 %v3637_v58, 0.0  ;;  %v3707_v59 = vmax.f32 %v3690_v60, 0.0  ;;  %v3712_v25 = vpack.c.bf16 %v3704_v62, %v3700_v19  ;;  %v3714_v13 = vpack.c.bf16 %v3706_v20, %v3702_v8  ;;  %s5542_s20 = scalar_lea.vmem %s4091_s9, 512  ;;  %p5547_p1 = scmp.lt.s32.totalorder %s4091_s9, %s4091_s9 }
 0x881   :  { %p5543_p0 = scmp.ne.s32.totalorder %s4091_s9, %s5542_s20  ;;  %p5548_p2 = scmp.lt.s32.totalorder %s5542_s20, %s5542_s20 }
 0x882   :  { %v3713_v17 = vpack.c.bf16 %v3705_v41, %v3701_v9  ;;  %v3715_v23 = vpack.c.bf16 %v3707_v59, %v3703_v29 }
 0x883   :  { %p5549_p3 = por %p5548_p2, %p5547_p1 }
 0x884   :  { %4019 = vmatprep.mubr.bf16.mxu0 %v3713_v17  ;;  %4068 = vmatprep.mubr.bf16.mxu1 %v3715_v23 }
 0x885   :  { %4020 = vmatmul.mubr.bf16.gmra.mxu0 %v3712_v25  ;;  %4069 = vmatmul.mubr.bf16.gmra.mxu1 %v3714_v13  ;;  %p5550_p4 = pnand %p5549_p3, %p5543_p0 }
 0x906   :  { %v4587_v24 = vpop.f32.mrf.mxu0  ;;  %v4615_v26 = vpop.f32.mrf.mxu1 }
 0x908   :  { %v4588_v46 = vpop.f32.mrf.mxu0  ;;  %v4616_v2 = vpop.f32.mrf.mxu1 }
 0x909   :  { %v4589_v7 = vadd.f32 %v4588_v46, %v4587_v24  ;;  %v4617_v0 = vadd.f32 %v4616_v2, %v4615_v26 }
 0x90a   :  { %v4590_v32 = vpop.f32.mrf.mxu0  ;;  %v4618_v42 = vpop.f32.mrf.mxu1 }
 0x90b   :  { %v4014_v54 = vadd.f32 %v4589_v7, %v4266_v15 }
 0x90c   :  { %v4591_v1 = vpop.f32.mrf.mxu0  ;;  %v4619_v6 = vpop.f32.mrf.mxu1 }
 0x90d   :  { %v4063_v36 = vadd.f32 %v4617_v0, %v4014_v54  ;;  %v4592_v39 = vadd.f32 %v4591_v1, %v4590_v32  ;;  %v4620_v43 = vadd.f32 %v4619_v6, %v4618_v42 }
 0x90f   :  { %v4077_v33 = vadd.f32 %v4063_v36, %v7076_v63  ;;  %v4017_v34 = vadd.f32 %v4592_v39, %v4266_v15 }
 0x911   :  { %4081 = vst [vmem:[#allocation2] sm:$0xff] %v4077_v33  ;;  %v4066_v55 = vadd.f32 %v4620_v43, %v4017_v34 }
 0x913   :  { %v4078_v16 = vadd.f32 %v4066_v55, %v7082_v12 }
 0x915   :  { %4082 = vst [vmem:[#allocation2 + $0x8] sm:$0xff] %v4078_v16 }
 0x945   :  { %v4593_v47 = vpop.f32.mrf.mxu0  ;;  %v4621_v21 = vpop.f32.mrf.mxu1 }
 0x947   :  { %v4594_v61 = vpop.f32.mrf.mxu0  ;;  %v4622_v49 = vpop.f32.mrf.mxu1 }
 0x948   :  { %v4595_v11 = vadd.f32 %v4594_v61, %v4593_v47  ;;  %v4623_v31 = vadd.f32 %v4622_v49, %v4621_v21 }
 0x949   :  { %v4596_v44 = vpop.f32.mrf.mxu0  ;;  %v4624_v30 = vpop.f32.mrf.mxu1 }
 0x94a   :  { %v4022_v50 = vadd.f32 %v4595_v11, %v4266_v15 }
 0x94b   :  { %v4597_v48 = vpop.f32.mrf.mxu0  ;;  %v4625_v51 = vpop.f32.mrf.mxu1 }
 0x94c   :  { %v4071_v53 = vadd.f32 %v4623_v31, %v4022_v50  ;;  %v4598_v63 = vadd.f32 %v4597_v48, %v4596_v44  ;;  %v4626_v45 = vadd.f32 %v4625_v51, %v4624_v30 }
 0x94e   :  { %v4079_v57 = vadd.f32 %v4071_v53, %v7088_v22  ;;  %v4025_v10 = vadd.f32 %v4598_v63, %v4266_v15 }
 0x950   :  { %4083 = vst [vmem:[#allocation2 + $0x10] sm:$0xff] %v4079_v57  ;;  %v4074_v12 = vadd.f32 %v4626_v45, %v4025_v10 }
 0x952   :  { %v4080_v14 = vadd.f32 %v4074_v12, %v7094_v37 }
 0x954   :  { %4084 = vst [vmem:[#allocation2 + $0x18] sm:$0xff] %v4080_v14 }
 0x955   :  { %5553 = shalt.err (!%p5550_p4)
}
 0x956   :  { %s5569_s3 = smov 128   ;;  %s5570_s0 = smov 8  }
 0x957   :  { %4096 = dma.vmem_to_hbm [thread:$0]  %s4091_s9, 512, %s7354_s14, [#allocation3], %s5569_s3, %s5569_s3, %s5570_s0  }
 0x958   :  { %5562 = dma.done.wait [#allocation3], 512  }
 0x959   :  { %5563 = vsyncadd [#allocation3], 4294966784 }
 0x95a   :  { %4100 = vsyncpa [#allocation3], 1 }

</bundles_post_ra>
